<compile_context>
chip_gen: v5e
topology: v5e:2x2
jax: 0.10.0
libtpu: 0.0.40
codegen_flags: <defaults>
</compile_context>

<pallas_src>
import jax
import jax.numpy as jnp
from jax.experimental import pallas as pl
from jax.experimental.pallas import tpu as pltpu

NB_STATE_VAR = 18    # ANM6Easy().state_N
NB_ACTION_VAR = 6    # ANM6Easy().action_space.shape[0]
HIDDEN = 512

# padded sizes (lane = 128); bf16 sublane packing is (16, 128)
IN_PAD = 128
OUT_PAD = 128
SUBLANE_BF16 = 16
BATCH_TILE = 512          # max rows per grid step

_VMEM_LIMIT = 32 << 20    # ~4 MiB real footprint at tb=512 + generous headroom


def _round_up(n, m):
    return ((n + m - 1) // m) * m


def _mlp_kernel(x_ref, w1_ref, w2_ref, b2_ref, w3_ref, b3_ref, o_ref):
    # layer 1: relu(x @ W1)   (b1 folded into row NB_STATE_VAR of W1;
    #                          x carries a 1.0 in that column; x already bf16)
    h1 = jnp.dot(x_ref[...], w1_ref[...], preferred_element_type=jnp.float32)
    h1 = jnp.maximum(h1, 0.0)

    # layer 2: relu(h1 @ W2 + b2)
    h2 = jnp.dot(h1.astype(jnp.bfloat16), w2_ref[...],
                 preferred_element_type=jnp.float32)
    h2 = jnp.maximum(h2 + b2_ref[...], 0.0)

    # layer 3: h2 @ W3 + b3  (no activation)
    out = jnp.dot(h2.astype(jnp.bfloat16), w3_ref[...],
                  preferred_element_type=jnp.float32)
    o_ref[...] = (out + b3_ref[...]).astype(o_ref.dtype)


def prepare_params(params):
    """One-time padding + bf16 cast of the weights (hoisted out of the call path)."""
    w1, b1, w2, b2, w3, b3 = params

    # W1: zero-pad K 18->128 and fold b1 into the (otherwise zero) row 18.
    w1_p = jnp.zeros((IN_PAD, HIDDEN), jnp.float32)
    w1_p = w1_p.at[:NB_STATE_VAR, :].set(w1)
    w1_p = w1_p.at[NB_STATE_VAR, :].set(b1)

    # W3 / b3: zero-pad N 6->128.
    w3_p = jnp.zeros((HIDDEN, OUT_PAD), jnp.float32).at[:, :NB_ACTION_VAR].set(w3)
    b3_p = jnp.zeros((1, OUT_PAD), jnp.float32).at[0, :NB_ACTION_VAR].set(b3)

    return (w1_p.astype(jnp.bfloat16),                  # [128, 512]  bf16
            w2.astype(jnp.bfloat16),                    # [512, 512]  bf16
            b2.reshape(1, HIDDEN).astype(jnp.float32),  # [1, 512]    f32
            w3_p.astype(jnp.bfloat16),                  # [512, 128]  bf16
            b3_p)                                       # [1, 128]    f32


def rf_continuous_forward(x, prepared_params):
    """x: [B, NB_STATE_VAR] float32 -> [B, NB_ACTION_VAR] float32."""
    w1_p, w2_b, b2_p, w3_p, b3_p = prepared_params
    B = x.shape[0]

    # Balanced batch tiling: n near-equal tiles of <= BATCH_TILE rows, each
    # rounded up to the bf16 sublane multiple (16).  B <= BATCH_TILE -> one tile.
    n_tiles = pl.cdiv(B, BATCH_TILE)
    tb = _round_up(pl.cdiv(B, n_tiles), SUBLANE_BF16)
    B_pad = n_tiles * tb

    # Padded activations built directly in bf16 (the kernel consumes them as-is).
    # Column NB_STATE_VAR carries the layer-1 bias fold.
    x_p = jnp.zeros((B_pad, IN_PAD), jnp.bfloat16)
    x_p = x_p.at[:B, :NB_STATE_VAR].set(x.astype(jnp.bfloat16))
    x_p = x_p.at[:, NB_STATE_VAR].set(1.0)

    def resident(shape):
        # Constant index_map -> block stays VMEM-resident across grid steps;
        # single-buffer it so the weights don't get a useless second buffer.
        return pl.BlockSpec(shape, lambda i: (0, 0), pipeline_mode=pl.Buffered(1))

    out_p = pl.pallas_call(
        _mlp_kernel,
        out_shape=jax.ShapeDtypeStruct((B_pad, OUT_PAD), jnp.float32),
        grid=(n_tiles,),
        in_specs=[
            pl.BlockSpec((tb, IN_PAD), lambda i: (i, 0)),   # x tile (pipelined, bf16)
            resident((IN_PAD, HIDDEN)),                     # W1 (+b1 row)
            resident((HIDDEN, HIDDEN)),                     # W2
            resident((1, HIDDEN)),                          # b2
            resident((HIDDEN, OUT_PAD)),                    # W3
            resident((1, OUT_PAD)),                         # b3
        ],
        out_specs=pl.BlockSpec((tb, OUT_PAD), lambda i: (i, 0)),
        compiler_params=pltpu.CompilerParams(
            dimension_semantics=("parallel",),
            vmem_limit_bytes=_VMEM_LIMIT,
        ),
    )(x_p, w1_p, w2_b, b2_p, w3_p, b3_p)

    return out_p[:B, :NB_ACTION_VAR]


def init_params(key):
    """Deterministic init matching nn.Linear shapes (stored as [in, out])."""
    k1, k2, k3, k4, k5, k6 = jax.random.split(key, 6)

    def lin(kw, kb, fan_in, fan_out):
        bound = 1.0 / jnp.sqrt(float(fan_in))
        w = jax.random.uniform(kw, (fan_in, fan_out), jnp.float32, -bound, bound)
        b = jax.random.uniform(kb, (fan_out,), jnp.float32, -bound, bound)
        return w, b

    w1, b1 = lin(k1, k2, NB_STATE_VAR, HIDDEN)
    w2, b2 = lin(k3, k4, HIDDEN, HIDDEN)
    w3, b3 = lin(k5, k6, HIDDEN, NB_ACTION_VAR)
    return (w1, b1, w2, b2, w3, b3)


def _reference_f32(x, params):
    """Pure-f32 reference (the original module semantics)."""
    w1, b1, w2, b2, w3, b3 = params
    h1 = jnp.maximum(x @ w1 + b1, 0.0)
    h2 = jnp.maximum(h1 @ w2 + b2, 0.0)
    return h2 @ w3 + b3


def _reference_bf16(x, params):
    """Reference mimicking the kernel's bf16-weight/activation, f32-accumulate math."""
    w1, b1, w2, b2, w3, b3 = params
    bf = jnp.bfloat16
    b1q = b1.astype(bf).astype(jnp.float32)  # b1 is stored as a bf16 row of W1
    h1 = jnp.maximum(
        jnp.dot(x.astype(bf), w1.astype(bf), preferred_element_type=jnp.float32) + b1q,
        0.0)
    h2 = jnp.maximum(
        jnp.dot(h1.astype(bf), w2.astype(bf), preferred_element_type=jnp.float32) + b2,
        0.0)
    return jnp.dot(h2.astype(bf), w3.astype(bf), preferred_element_type=jnp.float32) + b3


if __name__ == "__main__":
    key = jax.random.PRNGKey(0)
    kx, kp, kx2, kx3 = jax.random.split(key, 4)

    params = init_params(kp)
    prepared = prepare_params(params)     # one-time padding / bf16 cast

    fwd = jax.jit(rf_continuous_forward)

    # small batch (inference path, single grid step, tb=16)
    batch = 2
    x = jax.random.normal(kx, (batch, NB_STATE_VAR), jnp.float32)
    out = jax.block_until_ready(fwd(x, prepared))

    assert out.shape == (batch, NB_ACTION_VAR), out.shape
    assert jnp.allclose(out, _reference_bf16(x, params), atol=2e-3, rtol=2e-3), \
        "mismatch vs bf16-weight reference"
    assert jnp.allclose(out, _reference_f32(x, params), atol=5e-2, rtol=5e-2), \
        "mismatch vs f32 reference"

    # medium batch: single balanced 304-row tile (no longer 2x256)
    batch_med = 300
    xm = jax.random.normal(kx2, (batch_med, NB_STATE_VAR), jnp.float32)
    outm = jax.block_until_ready(fwd(xm, prepared))
    assert outm.shape == (batch_med, NB_ACTION_VAR), outm.shape
    assert jnp.allclose(outm, _reference_bf16(xm, params), atol=2e-3, rtol=2e-3), \
        "mismatch vs bf16-weight reference (medium batch)"

    # large batch exercising the multi-tile balanced grid path (2 tiles of 352)
    batch_big = 700
    xb = jax.random.normal(kx3, (batch_big, NB_STATE_VAR), jnp.float32)
    outb = jax.block_until_ready(fwd(xb, prepared))
    assert outb.shape == (batch_big, NB_ACTION_VAR), outb.shape
    assert jnp.allclose(outb, _reference_bf16(xb, params), atol=2e-3, rtol=2e-3), \
        "mismatch vs bf16-weight reference (large batch)"

    print("KERNEL_OK")
</pallas_src>

<mosaic_0001>
module attributes {stable_mosaic.version = 11 : i64} {
  func.func @_mlp_kernel(%arg0: i32, %arg1: memref<16x128xbf16, #tpu.memory_space<vmem>>, %arg2: memref<128x512xbf16, #tpu.memory_space<vmem>>, %arg3: memref<512x512xbf16, #tpu.memory_space<vmem>>, %arg4: memref<1x512xf32, #tpu.memory_space<vmem>>, %arg5: memref<512x128xbf16, #tpu.memory_space<vmem>>, %arg6: memref<1x128xf32, #tpu.memory_space<vmem>>, %arg7: memref<16x128xf32, #tpu.memory_space<vmem>>) attributes {dimension_semantics = [#tpu.dimension_semantics<parallel>], iteration_bounds = array<i64: 1>, scalar_prefetch = 0 : i64, scratch_operands = 0 : i64, tpu.core_type = #tpu.core_type<tc>, window_params = [{transform_indices = @transform_0, window_bounds = array<i64: 16, 128>}, {pipeline_mode = #tpu.pipeline_mode<synchronous>, transform_indices = @transform_1, window_bounds = array<i64: 128, 512>}, {pipeline_mode = #tpu.pipeline_mode<synchronous>, transform_indices = @transform_2, window_bounds = array<i64: 512, 512>}, {pipeline_mode = #tpu.pipeline_mode<synchronous>, transform_indices = @transform_3, window_bounds = array<i64: 1, 512>}, {pipeline_mode = #tpu.pipeline_mode<synchronous>, transform_indices = @transform_4, window_bounds = array<i64: 512, 128>}, {pipeline_mode = #tpu.pipeline_mode<synchronous>, transform_indices = @transform_5, window_bounds = array<i64: 1, 128>}, {transform_indices = @transform_6, window_bounds = array<i64: 16, 128>}]} {
    %c0 = arith.constant 0 : index
    %c0_0 = arith.constant 0 : index
    %0 = vector.load %arg1[%c0, %c0_0] : memref<16x128xbf16, #tpu.memory_space<vmem>>, vector<16x128xbf16>
    %c0_1 = arith.constant 0 : index
    %c0_2 = arith.constant 0 : index
    %1 = vector.load %arg2[%c0_1, %c0_2] : memref<128x512xbf16, #tpu.memory_space<vmem>>, vector<128x512xbf16>
    %cst = arith.constant dense<0.000000e+00> : vector<16x512xf32>
    %2 = tpu.matmul %0, %1, %cst {dimension_numbers = #tpu.dot_dimension_numbers<[1], [0], [0], [1], [0, 0, 1, 1], [], []>} : vector<16x128xbf16>, vector<128x512xbf16>, vector<16x512xf32> -> vector<16x512xf32>
    %cst_3 = arith.constant 0.000000e+00 : f32
    %3 = vector.broadcast %cst_3 : f32 to vector<16x512xf32>
    %4 = arith.maximumf %2, %3 : vector<16x512xf32>
    %5 = arith.truncf %4 : vector<16x512xf32> to vector<16x512xbf16>
    %c0_4 = arith.constant 0 : index
    %c0_5 = arith.constant 0 : index
    %6 = vector.load %arg3[%c0_4, %c0_5] : memref<512x512xbf16, #tpu.memory_space<vmem>>, vector<512x512xbf16>
    %cst_6 = arith.constant dense<0.000000e+00> : vector<16x512xf32>
    %7 = tpu.matmul %5, %6, %cst_6 {dimension_numbers = #tpu.dot_dimension_numbers<[1], [0], [0], [1], [0, 0, 1, 1], [], []>} : vector<16x512xbf16>, vector<512x512xbf16>, vector<16x512xf32> -> vector<16x512xf32>
    %c0_7 = arith.constant 0 : index
    %c0_8 = arith.constant 0 : index
    %8 = vector.load %arg4[%c0_7, %c0_8] : memref<1x512xf32, #tpu.memory_space<vmem>>, vector<1x512xf32>
    %9 = vector.broadcast %8 : vector<1x512xf32> to vector<16x512xf32>
    %10 = arith.addf %7, %9 : vector<16x512xf32>
    %cst_9 = arith.constant 0.000000e+00 : f32
    %11 = vector.broadcast %cst_9 : f32 to vector<16x512xf32>
    %12 = arith.maximumf %10, %11 : vector<16x512xf32>
    %13 = arith.truncf %12 : vector<16x512xf32> to vector<16x512xbf16>
    %c0_10 = arith.constant 0 : index
    %c0_11 = arith.constant 0 : index
    %14 = vector.load %arg5[%c0_10, %c0_11] : memref<512x128xbf16, #tpu.memory_space<vmem>>, vector<512x128xbf16>
    %cst_12 = arith.constant dense<0.000000e+00> : vector<16x128xf32>
    %15 = tpu.matmul %13, %14, %cst_12 {dimension_numbers = #tpu.dot_dimension_numbers<[1], [0], [0], [1], [0, 0, 1, 1], [], []>} : vector<16x512xbf16>, vector<512x128xbf16>, vector<16x128xf32> -> vector<16x128xf32>
    %c0_13 = arith.constant 0 : index
    %c0_14 = arith.constant 0 : index
    %16 = vector.load %arg6[%c0_13, %c0_14] : memref<1x128xf32, #tpu.memory_space<vmem>>, vector<1x128xf32>
    %17 = vector.broadcast %16 : vector<1x128xf32> to vector<16x128xf32>
    %18 = arith.addf %15, %17 : vector<16x128xf32>
    %c0_15 = arith.constant 0 : index
    %c0_16 = arith.constant 0 : index
    %19 = vector.load %arg7[%c0_15, %c0_16] : memref<16x128xf32, #tpu.memory_space<vmem>>, vector<16x128xf32>
    tpu.vector_store %arg7[%c0_15, %c0_16], %18 {strides = array<i32>} : memref<16x128xf32, #tpu.memory_space<vmem>>, vector<16x128xf32>,
    return
  }
  func.func @transform_0(%arg0: i32) -> (i32, i32) {
    %c0_i32 = arith.constant 0 : i32
    %c0_i32_0 = arith.constant 0 : i32
    return %arg0, %c0_i32 : i32, i32
  }
  func.func @transform_1(%arg0: i32) -> (i32, i32) {
    %c0_i32 = arith.constant 0 : i32
    %c0_i32_0 = arith.constant 0 : i32
    %c0_i32_1 = arith.constant 0 : i32
    return %c0_i32, %c0_i32_0 : i32, i32
  }
  func.func @transform_2(%arg0: i32) -> (i32, i32) {
    %c0_i32 = arith.constant 0 : i32
    %c0_i32_0 = arith.constant 0 : i32
    %c0_i32_1 = arith.constant 0 : i32
    return %c0_i32, %c0_i32_0 : i32, i32
  }
  func.func @transform_3(%arg0: i32) -> (i32, i32) {
    %c0_i32 = arith.constant 0 : i32
    %c0_i32_0 = arith.constant 0 : i32
    %c0_i32_1 = arith.constant 0 : i32
    return %c0_i32, %c0_i32_0 : i32, i32
  }
  func.func @transform_4(%arg0: i32) -> (i32, i32) {
    %c0_i32 = arith.constant 0 : i32
    %c0_i32_0 = arith.constant 0 : i32
    %c0_i32_1 = arith.constant 0 : i32
    return %c0_i32, %c0_i32_0 : i32, i32
  }
  func.func @transform_5(%arg0: i32) -> (i32, i32) {
    %c0_i32 = arith.constant 0 : i32
    %c0_i32_0 = arith.constant 0 : i32
    %c0_i32_1 = arith.constant 0 : i32
    return %c0_i32, %c0_i32_0 : i32, i32
  }
  func.func @transform_6(%arg0: i32) -> (i32, i32) {
    %c0_i32 = arith.constant 0 : i32
    %c0_i32_0 = arith.constant 0 : i32
    return %arg0, %c0_i32 : i32, i32
  }
}

</mosaic_0001>

<bundles_post_ra>
// kernel: rf_continuous_forward.1
= control target key start
LH: loop header
LB: loop body
LE: loop exit
PB: predicated region body
PF: predicated region fallthrough
CT: control target
= control target key end

     0   :  { %11 = vsyncpa [#allocation3], 0  ;;  %s2821_s0 = inlined_call_operand.vmem [shape: bf16[16,128], index: 0, kind: input, shape index: {}]   ;;  %s2822_s1 = inlined_call_operand.hbm [shape: bf16[128,512], index: 1, kind: input, shape index: {}]   ;;  %s2823_s2 = inlined_call_operand.hbm [shape: bf16[512,512], index: 2, kind: input, shape index: {}]   ;;  %s2824_s3 = inlined_call_operand.vmem [shape: f32[1,512], index: 3, kind: input, shape index: {}]   ;;  %s2825_s4 = inlined_call_operand.hbm [shape: bf16[512,128], index: 4, kind: input, shape index: {}]   ;;  %s2826_s5 = inlined_call_operand.vmem [shape: f32[1,128], index: 5, kind: input, shape index: {}]   ;;  %s2827_s6 = inlined_call_operand.vmem [shape: f32[16,128], index: 6, kind: output, shape index: {}]  }
   0x1   :  { %12 = vsyncpa [#allocation5], 0  ;;  %s32_s23 = sshll.u32 %s2823_s2, 4  ;;  %s2725_s24 = smov [#allocation4]   ;;  %s33_s23 = int_to_ptr.hbm [resolvable:$true] %s32_s23 }
   0x2   :  { %s34_s25 = sshll.u32 %s2725_s24, 4  ;;  %s19_s28 = sshll.u32 %s2822_s1, 4  ;;  %s35_s25 = int_to_ptr.vmem [resolvable:$true] %s34_s25  ;;  %s20_s28 = int_to_ptr.hbm [resolvable:$true] %s19_s28 }
   0x3   :  { %s2726_s29 = smov 256   ;;  %s2727_s30 = smov 16  }
   0x4   :  { %40 = dma.hbm_to_vmem [thread:$0]  %s33_s23, 16384, %s35_s25, [#allocation5], %s2726_s29, %s2726_s29, %s2727_s30  }
   0x5   :  { %s2728_s7 = smov [#allocation2]   ;;  %s47_s11 = sshll.u32 %s2825_s4, 4  ;;  %s48_s11 = int_to_ptr.hbm [resolvable:$true] %s47_s11 }
   0x6   :  { %s21_s8 = sshll.u32 %s2728_s7, 4  ;;  %s2729_s2 = smov [#allocation6]   ;;  %s22_s8 = int_to_ptr.vmem [resolvable:$true] %s21_s8 }
   0x7   :  { %27 = dma.hbm_to_vmem [thread:$0]  %s20_s28, 4096, %s22_s8, [#allocation3], %s2726_s29, %s2726_s29, %s2727_s30  }
   0x8   :  { %s49_s12 = sshll.u32 %s2729_s2, 4  ;;  %s2730_s13 = smov 64   ;;  %s50_s12 = int_to_ptr.vmem [resolvable:$true] %s49_s12 }
   0x9   :  { %s2731_s14 = smov 4  }
   0xa   :  { %55 = dma.hbm_to_vmem [thread:$0]  %s48_s11, 4096, %s50_s12, [#allocation5], %s2730_s13, %s2730_s13, %s2731_s14  }
   0xb   :  { %2721 = dma.done.wait [#allocation3], 4096  }
   0xc   :  { %2722 = vsyncadd [#allocation3], 4294963200 }
   0xd   :  { %2723 = dma.done.wait [#allocation5], 20480  }
   0xe   :  { %2724 = vsyncadd [#allocation5], 4294946816  ;;  %v1794_v0 = vld [vmem:[#allocation2 + $0xe0] sm:$0xf]  ;;  %v2479_v1 = vld [vmem:[#allocation2 + $0xec] sm:$0xf0] }
   0xf   :  { %v2477_v2 = vld [vmem:[#allocation2 + $0xe4] sm:$0xf]  ;;  %v1795_v3 = vor.u32 %v2479_v1, %v1794_v0  ;;  %v1796_v4 = vld [vmem:[#allocation2 + $0xf0] sm:$0xf0]  ;;  %v1802_v5 = vld [vmem:[#allocation2 + $0xe8] sm:$0xf] }
  0x10   :  { %v2480_v6 = vld [vmem:[#allocation2 + $0xf4] sm:$0xf0]  ;;  %v1799_v7 = vor.u32 %v2477_v2, %v1796_v4  ;;  %v2478_v9 = vld [vmem:[#allocation2 + $0xec] sm:$0xf]  ;;  %v1804_v10 = vld [vmem:[#allocation2 + $0xf8] sm:$0xf0] }
  0x11   :  { %v1803_v8 = vor.u32 %v2480_v6, %v1802_v5  ;;  %v1778_v11 = vld [vmem:[#allocation2 + $0xc0] sm:$0xf]  ;;  %270 = vmatpush.bf16.msra.mxu0 %v1795_v3  ;;  %v1807_v12 = vor.u32 %v2478_v9, %v1804_v10  ;;  %v2475_v13 = vld [vmem:[#allocation2 + $0xcc] sm:$0xf0]  ;;  %v2473_v14 = vld [vmem:[#allocation2 + $0xc4] sm:$0xf] }
  0x12   :  { %v1780_v15 = vld [vmem:[#allocation2 + $0xd0] sm:$0xf0]  ;;  %284 = vmatpush.bf16.msra.mxu1 %v1799_v7  ;;  %v1779_v16 = vor.u32 %v2475_v13, %v1778_v11  ;;  %v1786_v18 = vld [vmem:[#allocation2 + $0xc8] sm:$0xf]  ;;  %v2476_v19 = vld [vmem:[#allocation2 + $0xd4] sm:$0xf0] }
  0x13   :  { %298 = vmatpush.bf16.msra.mxu2 %v1803_v8  ;;  %v1783_v17 = vor.u32 %v2473_v14, %v1780_v15  ;;  %v2474_v20 = vld [vmem:[#allocation2 + $0xcc] sm:$0xf]  ;;  %312 = vmatpush.bf16.msra.mxu3 %v1807_v12  ;;  %v1787_v21 = vor.u32 %v2476_v19, %v1786_v18  ;;  %v1788_v22 = vld [vmem:[#allocation2 + $0xd8] sm:$0xf0]  ;;  %v1762_v23 = vld [vmem:[#allocation2 + $0xa0] sm:$0xf] }
  0x14   :  { %v2471_v24 = vld [vmem:[#allocation2 + $0xac] sm:$0xf0]  ;;  %v1791_v25 = vor.u32 %v2474_v20, %v1788_v22  ;;  %v2469_v26 = vld [vmem:[#allocation2 + $0xa4] sm:$0xf]  ;;  %v1764_v27 = vld [vmem:[#allocation2 + $0xb0] sm:$0xf0] }
  0x15   :  { %v1770_v28 = vld [vmem:[#allocation2 + $0xa8] sm:$0xf]  ;;  %271 = vmatpush.bf16.msra.mxu0 %v1779_v16  ;;  %v1763_v29 = vor.u32 %v2471_v24, %v1762_v23  ;;  %v2472_v30 = vld [vmem:[#allocation2 + $0xb4] sm:$0xf0]  ;;  %v2470_v31 = vld [vmem:[#allocation2 + $0xac] sm:$0xf]  ;;  %v1767_v33 = vor.u32 %v2469_v26, %v1764_v27 }
  0x16   :  { %v1772_v32 = vld [vmem:[#allocation2 + $0xb8] sm:$0xf0]  ;;  %285 = vmatpush.bf16.msra.mxu1 %v1783_v17  ;;  %v1771_v34 = vor.u32 %v2472_v30, %v1770_v28  ;;  %v1746_v35 = vld [vmem:[#allocation2 + $0x80] sm:$0xf]  ;;  %v2467_v36 = vld [vmem:[#allocation2 + $0x8c] sm:$0xf0] }
  0x17   :  { %299 = vmatpush.bf16.msra.mxu2 %v1787_v21  ;;  %v2465_v37 = vld [vmem:[#allocation2 + $0x84] sm:$0xf]  ;;  %313 = vmatpush.bf16.msra.mxu3 %v1791_v25  ;;  %v1775_v38 = vor.u32 %v2470_v31, %v1772_v32  ;;  %v1748_v39 = vld [vmem:[#allocation2 + $0x90] sm:$0xf0]  ;;  %v1754_v40 = vld [vmem:[#allocation2 + $0x88] sm:$0xf]  ;;  %v1747_v44 = vor.u32 %v2467_v36, %v1746_v35 }
  0x18   :  { %v2468_v41 = vld [vmem:[#allocation2 + $0x94] sm:$0xf0]  ;;  %v2466_v42 = vld [vmem:[#allocation2 + $0x8c] sm:$0xf]  ;;  %v1756_v43 = vld [vmem:[#allocation2 + $0x98] sm:$0xf0]  ;;  %v1751_v45 = vor.u32 %v2465_v37, %v1748_v39 }
  0x19   :  { %272 = vmatpush.bf16.msra.mxu0 %v1763_v29  ;;  %v1755_v46 = vor.u32 %v2468_v41, %v1754_v40  ;;  %v1730_v47 = vld [vmem:[#allocation2 + $0x60] sm:$0xf]  ;;  %v2463_v48 = vld [vmem:[#allocation2 + $0x6c] sm:$0xf0]  ;;  %v2461_v49 = vld [vmem:[#allocation2 + $0x64] sm:$0xf]  ;;  %v1759_v50 = vor.u32 %v2466_v42, %v1756_v43 }
  0x1a   :  { %286 = vmatpush.bf16.msra.mxu1 %v1767_v33  ;;  %v1732_v51 = vld [vmem:[#allocation2 + $0x70] sm:$0xf0]  ;;  %v1738_v52 = vld [vmem:[#allocation2 + $0x68] sm:$0xf]  ;;  %v2464_v53 = vld [vmem:[#allocation2 + $0x74] sm:$0xf0]  ;;  %v1731_v56 = vor.u32 %v2463_v48, %v1730_v47 }
  0x1b   :  { %300 = vmatpush.bf16.msra.mxu2 %v1771_v34  ;;  %314 = vmatpush.bf16.msra.mxu3 %v1775_v38  ;;  %v2462_v54 = vld [vmem:[#allocation2 + $0x6c] sm:$0xf]  ;;  %v1740_v55 = vld [vmem:[#allocation2 + $0x78] sm:$0xf0]  ;;  %v1735_v57 = vor.u32 %v2461_v49, %v1732_v51  ;;  %v1739_v58 = vor.u32 %v2464_v53, %v1738_v52  ;;  %v1714_v59 = vld [vmem:[#allocation2 + $0x40] sm:$0xf] }
  0x1c   :  { %v2459_v60 = vld [vmem:[#allocation2 + $0x4c] sm:$0xf0]  ;;  %v2457_v61 = vld [vmem:[#allocation2 + $0x44] sm:$0xf]  ;;  %v1743_v62 = vor.u32 %v2462_v54, %v1740_v55  ;;  %v1716_v63 = vld [vmem:[#allocation2 + $0x50] sm:$0xf0] }
  0x1d   :  { %273 = vmatpush.bf16.msra.mxu0 %v1747_v44  ;;  %v1722_v0 = vld [vmem:[#allocation2 + $0x48] sm:$0xf]  ;;  %v2460_v1 = vld [vmem:[#allocation2 + $0x54] sm:$0xf0]  ;;  %v2458_v2 = vld [vmem:[#allocation2 + $0x4c] sm:$0xf]  ;;  %v1715_v4 = vor.u32 %v2459_v60, %v1714_v59  ;;  %v1719_v5 = vor.u32 %v2457_v61, %v1716_v63 }
  0x1e   :  { %287 = vmatpush.bf16.msra.mxu1 %v1751_v45  ;;  %v1724_v3 = vld [vmem:[#allocation2 + $0x58] sm:$0xf0]  ;;  %v1723_v6 = vor.u32 %v2460_v1, %v1722_v0  ;;  %v1698_v7 = vld [vmem:[#allocation2 + $0x20] sm:$0xf]  ;;  %v2455_v8 = vld [vmem:[#allocation2 + $0x2c] sm:$0xf0] }
  0x1f   :  { %301 = vmatpush.bf16.msra.mxu2 %v1755_v46  ;;  %315 = vmatpush.bf16.msra.mxu3 %v1759_v50  ;;  %v2453_v9 = vld [vmem:[#allocation2 + $0x24] sm:$0xf]  ;;  %v1727_v10 = vor.u32 %v2458_v2, %v1724_v3  ;;  %v1700_v11 = vld [vmem:[#allocation2 + $0x30] sm:$0xf0]  ;;  %v1706_v12 = vld [vmem:[#allocation2 + $0x28] sm:$0xf]  ;;  %v1699_v16 = vor.u32 %v2455_v8, %v1698_v7 }
  0x20   :  { %v2456_v13 = vld [vmem:[#allocation2 + $0x34] sm:$0xf0]  ;;  %v2454_v14 = vld [vmem:[#allocation2 + $0x2c] sm:$0xf]  ;;  %v1708_v15 = vld [vmem:[#allocation2 + $0x38] sm:$0xf0]  ;;  %v1703_v18 = vor.u32 %v2453_v9, %v1700_v11 }
  0x21   :  { %274 = vmatpush.bf16.msra.mxu0 %v1731_v56  ;;  %v1682_v17 = vld [vmem:[#allocation2] sm:$0xf]  ;;  %v1707_v19 = vor.u32 %v2456_v13, %v1706_v12  ;;  %v2451_v20 = vld [vmem:[#allocation2 + $0xc] sm:$0xf0]  ;;  %v2449_v21 = vld [vmem:[#allocation2 + $0x4] sm:$0xf]  ;;  %v1711_v23 = vor.u32 %v2454_v14, %v1708_v15 }
  0x22   :  { %288 = vmatpush.bf16.msra.mxu1 %v1735_v57  ;;  %v1684_v22 = vld [vmem:[#allocation2 + $0x10] sm:$0xf0]  ;;  %v1690_v24 = vld [vmem:[#allocation2 + $0x8] sm:$0xf]  ;;  %v2452_v25 = vld [vmem:[#allocation2 + $0x14] sm:$0xf0]  ;;  %v1683_v30 = vor.u32 %v2451_v20, %v1682_v17 }
  0x23   :  { %302 = vmatpush.bf16.msra.mxu2 %v1739_v58  ;;  %316 = vmatpush.bf16.msra.mxu3 %v1743_v62  ;;  %v2450_v26 = vld [vmem:[#allocation2 + $0xc] sm:$0xf]  ;;  %v1692_v27 = vld [vmem:[#allocation2 + $0x18] sm:$0xf0]  ;;  %v1922_v28 = vld [vmem:[#allocation4 + $0xe0] sm:$0xf]  ;;  %v1687_v33 = vor.u32 %v2449_v21, %v1684_v22  ;;  %v1691_v34 = vor.u32 %v2452_v25, %v1690_v24 }
  0x24   :  { %v2511_v29 = vld [vmem:[#allocation4 + $0xec] sm:$0xf0]  ;;  %v2050_v31 = vld [vmem:[#allocation4 + $0x1e0] sm:$0xf]  ;;  %v1695_v36 = vor.u32 %v2450_v26, %v1692_v27 }
  0x25   :  { %275 = vmatpush.bf16.msra.mxu0 %v1715_v4  ;;  %v2543_v32 = vld [vmem:[#allocation4 + $0x1ec] sm:$0xf0]  ;;  %v2448_v35 = vld [vmem:[%s2821_s0] sm:$0xff]  ;;  %v1923_v37 = vor.u32 %v2511_v29, %v1922_v28 }
  0x26   :  { %289 = vmatpush.bf16.msra.mxu1 %v1719_v5  ;;  %v1906_v38 = vld [vmem:[#allocation4 + $0xc0] sm:$0xf]  ;;  %v2575_v40 = vld [vmem:[#allocation4 + $0x2ec] sm:$0xf0]  ;;  %v2051_v41 = vor.u32 %v2543_v32, %v2050_v31 }
  0x27   :  { %303 = vmatpush.bf16.msra.mxu2 %v1723_v6  ;;  %317 = vmatpush.bf16.msra.mxu3 %v1727_v10  ;;  %v2178_v39 = vld [vmem:[#allocation4 + $0x2e0] sm:$0xf]  ;;  %v2507_v42 = vld [vmem:[#allocation4 + $0xcc] sm:$0xf0] }
  0x28   :  { %v2306_v43 = vld [vmem:[#allocation4 + $0x3e0] sm:$0xf]  ;;  %v2607_v44 = vld [vmem:[#allocation4 + $0x3ec] sm:$0xf0]  ;;  %v2179_v47 = vor.u32 %v2575_v40, %v2178_v39  ;;  %v1907_v48 = vor.u32 %v2507_v42, %v1906_v38 }
  0x29   :  { %276 = vmatpush.bf16.msra.mxu0 %v1699_v16  ;;  %v2034_v45 = vld [vmem:[#allocation4 + $0x1c0] sm:$0xf]  ;;  %v2539_v46 = vld [vmem:[#allocation4 + $0x1cc] sm:$0xf0]  ;;  %v2307_v49 = vor.u32 %v2607_v44, %v2306_v43 }
  0x2a   :  { %290 = vmatpush.bf16.msra.mxu1 %v1703_v18  ;;  %v1890_v50 = vld [vmem:[#allocation4 + $0xa0] sm:$0xf]  ;;  %v2571_v52 = vld [vmem:[#allocation4 + $0x2cc] sm:$0xf0]  ;;  %v2035_v53 = vor.u32 %v2539_v46, %v2034_v45 }
  0x2b   :  { %304 = vmatpush.bf16.msra.mxu2 %v1707_v19  ;;  %318 = vmatpush.bf16.msra.mxu3 %v1711_v23  ;;  %v2162_v51 = vld [vmem:[#allocation4 + $0x2c0] sm:$0xf]  ;;  %v2503_v54 = vld [vmem:[#allocation4 + $0xac] sm:$0xf0] }
  0x2c   :  { %v2290_v55 = vld [vmem:[#allocation4 + $0x3c0] sm:$0xf]  ;;  %v2603_v56 = vld [vmem:[#allocation4 + $0x3cc] sm:$0xf0]  ;;  %v2163_v59 = vor.u32 %v2571_v52, %v2162_v51  ;;  %v1891_v60 = vor.u32 %v2503_v54, %v1890_v50 }
  0x2d   :  { %277 = vmatpush.bf16.msra.mxu0 %v1683_v30  ;;  %v2018_v57 = vld [vmem:[#allocation4 + $0x1a0] sm:$0xf]  ;;  %v2535_v58 = vld [vmem:[#allocation4 + $0x1ac] sm:$0xf0]  ;;  %v2291_v61 = vor.u32 %v2603_v56, %v2290_v55  ;;  %v2509_v55 = vld [vmem:[#allocation4 + $0xe4] sm:$0xf] }
  0x2e   :  { %291 = vmatpush.bf16.msra.mxu1 %v1687_v33  ;;  %v1874_v62 = vld [vmem:[#allocation4 + $0x80] sm:$0xf]  ;;  %v2567_v0 = vld [vmem:[#allocation4 + $0x2ac] sm:$0xf0]  ;;  %v2019_v1 = vor.u32 %v2535_v58, %v2018_v57  ;;  %v1924_v56 = vld [vmem:[#allocation4 + $0xf0] sm:$0xf0] }
  0x2f   :  { %305 = vmatpush.bf16.msra.mxu2 %v1691_v34  ;;  %319 = vmatpush.bf16.msra.mxu3 %v1695_v36  ;;  %v2146_v63 = vld [vmem:[#allocation4 + $0x2a0] sm:$0xf]  ;;  %v2499_v2 = vld [vmem:[#allocation4 + $0x8c] sm:$0xf0]  ;;  %v2541_v57 = vld [vmem:[#allocation4 + $0x1e4] sm:$0xf] }
  0x30   :  { %278 = vmatmul.bf16.vlgmr.msra.gmra.mxu0 %v2448_v35  ;;  %v2274_v3 = vld [vmem:[#allocation4 + $0x3a0] sm:$0xf]  ;;  %v2599_v4 = vld [vmem:[#allocation4 + $0x3ac] sm:$0xf0]  ;;  %v2147_v7 = vor.u32 %v2567_v0, %v2146_v63  ;;  %v1875_v8 = vor.u32 %v2499_v2, %v1874_v62  ;;  %v2052_v58 = vld [vmem:[#allocation4 + $0x1f0] sm:$0xf0] }
  0x31   :  { %1116 = vmatpush.bf16.msrb.mxu0 %v1923_v37  ;;  %292 = vmatmul.bf16.vlgmr.msra.gmra.mxu1 %v2448_v35  ;;  %v2002_v5 = vld [vmem:[#allocation4 + $0x180] sm:$0xf]  ;;  %v2531_v6 = vld [vmem:[#allocation4 + $0x18c] sm:$0xf0]  ;;  %v2275_v9 = vor.u32 %v2599_v4, %v2274_v3  ;;  %v2505_v62 = vld [vmem:[#allocation4 + $0xc4] sm:$0xf]  ;;  %v1927_v3 = vor.u32 %v2509_v55, %v1924_v56 }
  0x32   :  { %1130 = vmatpush.bf16.msrb.mxu1 %v2051_v41  ;;  %306 = vmatmul.bf16.vlgmr.msra.gmra.mxu2 %v2448_v35  ;;  %v1858_v10 = vld [vmem:[#allocation4 + $0x60] sm:$0xf]  ;;  %v2563_v12 = vld [vmem:[#allocation4 + $0x28c] sm:$0xf0]  ;;  %v2003_v13 = vor.u32 %v2531_v6, %v2002_v5  ;;  %v2573_v5 = vld [vmem:[#allocation4 + $0x2e4] sm:$0xf] }
  0x33   :  { %320 = vmatmul.bf16.vlgmr.msra.gmra.mxu3 %v2448_v35  ;;  %1144 = vmatpush.bf16.msrb.mxu2 %v2179_v47  ;;  %v2130_v11 = vld [vmem:[#allocation4 + $0x280] sm:$0xf]  ;;  %v2495_v14 = vld [vmem:[#allocation4 + $0x6c] sm:$0xf0]  ;;  %v2180_v6 = vld [vmem:[#allocation4 + $0x2f0] sm:$0xf0] }
  0x34   :  { %1158 = vmatpush.bf16.msrb.mxu3 %v2307_v49  ;;  %v2258_v15 = vld [vmem:[#allocation4 + $0x380] sm:$0xf]  ;;  %v2595_v16 = vld [vmem:[#allocation4 + $0x38c] sm:$0xf0]  ;;  %v2131_v19 = vor.u32 %v2563_v12, %v2130_v11  ;;  %v1859_v20 = vor.u32 %v2495_v14, %v1858_v10  ;;  %v2308_v10 = vld [vmem:[#allocation4 + $0x3f0] sm:$0xf0] }
  0x35   :  { %1117 = vmatpush.bf16.msrb.mxu0 %v1907_v48  ;;  %v1986_v17 = vld [vmem:[#allocation4 + $0x160] sm:$0xf]  ;;  %v2527_v18 = vld [vmem:[#allocation4 + $0x16c] sm:$0xf0]  ;;  %v2259_v21 = vor.u32 %v2595_v16, %v2258_v15  ;;  %v2537_v11 = vld [vmem:[#allocation4 + $0x1c4] sm:$0xf]  ;;  %v2183_v15 = vor.u32 %v2573_v5, %v2180_v6 }
  0x36   :  { %1131 = vmatpush.bf16.msrb.mxu1 %v2035_v53  ;;  %v1842_v22 = vld [vmem:[#allocation4 + $0x40] sm:$0xf]  ;;  %v2559_v24 = vld [vmem:[#allocation4 + $0x26c] sm:$0xf0]  ;;  %v1987_v25 = vor.u32 %v2527_v18, %v1986_v17  ;;  %v2036_v12 = vld [vmem:[#allocation4 + $0x1d0] sm:$0xf0] }
  0x37   :  { %1145 = vmatpush.bf16.msrb.mxu2 %v2163_v59  ;;  %v2114_v23 = vld [vmem:[#allocation4 + $0x260] sm:$0xf]  ;;  %v2491_v26 = vld [vmem:[#allocation4 + $0x4c] sm:$0xf0]  ;;  %v2501_v18 = vld [vmem:[#allocation4 + $0xa4] sm:$0xf] }
  0x38   :  { %1159 = vmatpush.bf16.msrb.mxu3 %v2291_v61  ;;  %v2242_v27 = vld [vmem:[#allocation4 + $0x360] sm:$0xf]  ;;  %v2591_v28 = vld [vmem:[#allocation4 + $0x36c] sm:$0xf0]  ;;  %v2115_v31 = vor.u32 %v2559_v24, %v2114_v23  ;;  %v1843_v32 = vor.u32 %v2491_v26, %v1842_v22  ;;  %v1892_v22 = vld [vmem:[#allocation4 + $0xb0] sm:$0xf0] }
  0x39   :  { %1118 = vmatpush.bf16.msrb.mxu0 %v1891_v60  ;;  %v1970_v29 = vld [vmem:[#allocation4 + $0x140] sm:$0xf]  ;;  %v2523_v30 = vld [vmem:[#allocation4 + $0x14c] sm:$0xf0]  ;;  %v2243_v33 = vor.u32 %v2591_v28, %v2242_v27  ;;  %v2601_v23 = vld [vmem:[#allocation4 + $0x3c4] sm:$0xf]  ;;  %v1895_v28 = vor.u32 %v2501_v18, %v1892_v22 }
  0x3a   :  { %1132 = vmatpush.bf16.msrb.mxu1 %v2019_v1  ;;  %v1826_v34 = vld [vmem:[#allocation4 + $0x20] sm:$0xf]  ;;  %v2555_v36 = vld [vmem:[#allocation4 + $0x24c] sm:$0xf0]  ;;  %v1971_v37 = vor.u32 %v2523_v30, %v1970_v29  ;;  %v2292_v24 = vld [vmem:[#allocation4 + $0x3d0] sm:$0xf0] }
  0x3b   :  { %1146 = vmatpush.bf16.msrb.mxu2 %v2147_v7  ;;  %v2098_v35 = vld [vmem:[#allocation4 + $0x240] sm:$0xf]  ;;  %v2487_v38 = vld [vmem:[#allocation4 + $0x2c] sm:$0xf0]  ;;  %v2055_v7 = vor.u32 %v2541_v57, %v2052_v58  ;;  %v2020_v26 = vld [vmem:[#allocation4 + $0x1b0] sm:$0xf0]  ;;  %v2295_v29 = vor.u32 %v2601_v23, %v2292_v24 }
  0x3c   :  { %1160 = vmatpush.bf16.msrb.mxu3 %v2275_v9  ;;  %v2226_v39 = vld [vmem:[#allocation4 + $0x340] sm:$0xf]  ;;  %v2587_v40 = vld [vmem:[#allocation4 + $0x34c] sm:$0xf0]  ;;  %v2099_v43 = vor.u32 %v2555_v36, %v2098_v35  ;;  %v1827_v45 = vor.u32 %v2487_v38, %v1826_v34  ;;  %v2605_v9 = vld [vmem:[#allocation4 + $0x3e4] sm:$0xf] }
  0x3d   :  { %1119 = vmatpush.bf16.msrb.mxu0 %v1875_v8  ;;  %v1954_v41 = vld [vmem:[#allocation4 + $0x120] sm:$0xf]  ;;  %v2519_v42 = vld [vmem:[#allocation4 + $0x12c] sm:$0xf0]  ;;  %v2227_v46 = vor.u32 %v2587_v40, %v2226_v39  ;;  %v1908_v8 = vld [vmem:[#allocation4 + $0xd0] sm:$0xf0]  ;;  %v2311_v17 = vor.u32 %v2605_v9, %v2308_v10 }
  0x3e   :  { %1133 = vmatpush.bf16.msrb.mxu1 %v2003_v13  ;;  %v1810_v44 = vld [vmem:[#allocation4] sm:$0xf]  ;;  %v2483_v47 = vld [vmem:[#allocation4 + $0xc] sm:$0xf0]  ;;  %v1955_v50 = vor.u32 %v2519_v42, %v1954_v41  ;;  %v1911_v16 = vor.u32 %v2505_v62, %v1908_v8  ;;  %v2497_v30 = vld [vmem:[#allocation4 + $0x84] sm:$0xf] }
  0x3f   :  { %1147 = vmatpush.bf16.msrb.mxu2 %v2131_v19  ;;  %v2082_v48 = vld [vmem:[#allocation4 + $0x220] sm:$0xf]  ;;  %v2551_v49 = vld [vmem:[#allocation4 + $0x22c] sm:$0xf0]  ;;  %v1811_v60 = vor.u32 %v2483_v47, %v1810_v44  ;;  %v2569_v19 = vld [vmem:[#allocation4 + $0x2c4] sm:$0xf] }
  0x40   :  { %1161 = vmatpush.bf16.msrb.mxu3 %v2259_v21  ;;  %v1938_v51 = vld [vmem:[#allocation4 + $0x100] sm:$0xf]  ;;  %v2583_v53 = vld [vmem:[#allocation4 + $0x32c] sm:$0xf0]  ;;  %v2083_v59 = vor.u32 %v2551_v49, %v2082_v48  ;;  %v2039_v21 = vor.u32 %v2537_v11, %v2036_v12  ;;  %v1876_v34 = vld [vmem:[#allocation4 + $0x90] sm:$0xf0] }
  0x41   :  { %1120 = vmatpush.bf16.msrb.mxu0 %v1859_v20  ;;  %v2210_v52 = vld [vmem:[#allocation4 + $0x320] sm:$0xf]  ;;  %v2515_v54 = vld [vmem:[#allocation4 + $0x10c] sm:$0xf0]  ;;  %v2164_v20 = vld [vmem:[#allocation4 + $0x2d0] sm:$0xf0]  ;;  %v1879_v40 = vor.u32 %v2497_v30, %v1876_v34 }
  0x42   :  { %1134 = vmatpush.bf16.msrb.mxu1 %v1987_v25  ;;  %v2211_v61 = vor.u32 %v2583_v53, %v2210_v52  ;;  %v2066_v63 = vld [vmem:[#allocation4 + $0x200] sm:$0xf]  ;;  %v2547_v0 = vld [vmem:[#allocation4 + $0x20c] sm:$0xf0]  ;;  %v1939_v2 = vor.u32 %v2515_v54, %v1938_v51  ;;  %v2533_v25 = vld [vmem:[#allocation4 + $0x1a4] sm:$0xf]  ;;  %v2167_v27 = vor.u32 %v2569_v19, %v2164_v20 }
  0x43   :  { %1148 = vmatpush.bf16.msrb.mxu2 %v2115_v31  ;;  %v2194_v1 = vld [vmem:[#allocation4 + $0x300] sm:$0xf]  ;;  %v2579_v4 = vld [vmem:[#allocation4 + $0x30c] sm:$0xf0]  ;;  %v2067_v13 = vor.u32 %v2547_v0, %v2066_v63  ;;  %v2565_v31 = vld [vmem:[#allocation4 + $0x2a4] sm:$0xf] }
  0x44   :  { %1162 = vmatpush.bf16.msrb.mxu3 %v2243_v33  ;;  %v2195_v14 = vor.u32 %v2579_v4, %v2194_v1  ;;  %v2023_v33 = vor.u32 %v2533_v25, %v2020_v26  ;;  %v2597_v35 = vld [vmem:[#allocation4 + $0x3a4] sm:$0xf]  ;;  %v2276_v36 = vld [vmem:[#allocation4 + $0x3b0] sm:$0xf0] }
  0x45   :  { %1121 = vmatpush.bf16.msrb.mxu0 %v1843_v32  ;;  %v2148_v32 = vld [vmem:[#allocation4 + $0x2b0] sm:$0xf0]  ;;  %v2279_v41 = vor.u32 %v2597_v35, %v2276_v36  ;;  %v2561_v49 = vld [vmem:[#allocation4 + $0x284] sm:$0xf] }
  0x46   :  { %1135 = vmatpush.bf16.msrb.mxu1 %v1971_v37  ;;  %v2529_v37 = vld [vmem:[#allocation4 + $0x184] sm:$0xf]  ;;  %v2004_v38 = vld [vmem:[#allocation4 + $0x190] sm:$0xf0]  ;;  %v2151_v39 = vor.u32 %v2565_v31, %v2148_v32 }
  0x47   :  { %1149 = vmatpush.bf16.msrb.mxu2 %v2099_v43  ;;  %v2007_v42 = vor.u32 %v2529_v37, %v2004_v38  ;;  %v2493_v43 = vld [vmem:[#allocation4 + $0x64] sm:$0xf]  ;;  %v1860_v44 = vld [vmem:[#allocation4 + $0x70] sm:$0xf0]  ;;  %v1930_v37 = vld [vmem:[#allocation4 + $0xe8] sm:$0xf] }
  0x48   :  { %1163 = vmatpush.bf16.msrb.mxu3 %v2227_v46  ;;  %v1863_v46 = vor.u32 %v2493_v43, %v1860_v44  ;;  %v1988_v47 = vld [vmem:[#allocation4 + $0x170] sm:$0xf0]  ;;  %v2593_v51 = vld [vmem:[#allocation4 + $0x384] sm:$0xf]  ;;  %v2512_v38 = vld [vmem:[#allocation4 + $0xf4] sm:$0xf0] }
  0x49   :  { %1122 = vmatpush.bf16.msrb.mxu0 %v1827_v45  ;;  %v2525_v45 = vld [vmem:[#allocation4 + $0x164] sm:$0xf]  ;;  %v2260_v53 = vld [vmem:[#allocation4 + $0x390] sm:$0xf0]  ;;  %v2544_v43 = vld [vmem:[#allocation4 + $0x1f4] sm:$0xf0] }
  0x4a   :  { %1136 = vmatpush.bf16.msrb.mxu1 %v1955_v50  ;;  %v1991_v48 = vor.u32 %v2525_v45, %v1988_v47  ;;  %v2132_v50 = vld [vmem:[#allocation4 + $0x290] sm:$0xf0]  ;;  %v2489_v54 = vld [vmem:[#allocation4 + $0x44] sm:$0xf]  ;;  %v2263_v56 = vor.u32 %v2593_v51, %v2260_v53  ;;  %v1931_v47 = vor.u32 %v2512_v38, %v1930_v37  ;;  %v2508_v51 = vld [vmem:[#allocation4 + $0xd4] sm:$0xf0] }
  0x4b   :  { %1150 = vmatpush.bf16.msrb.mxu2 %v2083_v59  ;;  %v2135_v52 = vor.u32 %v2561_v49, %v2132_v50  ;;  %v1844_v55 = vld [vmem:[#allocation4 + $0x50] sm:$0xf0]  ;;  %v2521_v58 = vld [vmem:[#allocation4 + $0x144] sm:$0xf]  ;;  %v1914_v50 = vld [vmem:[#allocation4 + $0xc8] sm:$0xf] }
  0x4c   :  { %1164 = vmatpush.bf16.msrb.mxu3 %v2211_v61  ;;  %v1847_v57 = vor.u32 %v2489_v54, %v1844_v55  ;;  %v1972_v59 = vld [vmem:[#allocation4 + $0x150] sm:$0xf0]  ;;  %v2557_v61 = vld [vmem:[#allocation4 + $0x264] sm:$0xf]  ;;  %v2042_v53 = vld [vmem:[#allocation4 + $0x1c8] sm:$0xf]  ;;  %v1915_v55 = vor.u32 %v2508_v51, %v1914_v50 }
  0x4d   :  { %1123 = vmatpush.bf16.msrb.mxu0 %v1811_v60  ;;  %v1975_v60 = vor.u32 %v2521_v58, %v1972_v59  ;;  %v2116_v62 = vld [vmem:[#allocation4 + $0x270] sm:$0xf0]  ;;  %v2589_v63 = vld [vmem:[#allocation4 + $0x364] sm:$0xf]  ;;  %v2540_v54 = vld [vmem:[#allocation4 + $0x1d4] sm:$0xf0] }
  0x4e   :  { %1137 = vmatpush.bf16.msrb.mxu1 %v1939_v2  ;;  %v2119_v0 = vor.u32 %v2557_v61, %v2116_v62  ;;  %v2244_v1 = vld [vmem:[#allocation4 + $0x370] sm:$0xf0]  ;;  %v2517_v5 = vld [vmem:[#allocation4 + $0x124] sm:$0xf]  ;;  %v2314_v58 = vld [vmem:[#allocation4 + $0x3e8] sm:$0xf] }
  0x4f   :  { %1151 = vmatpush.bf16.msrb.mxu2 %v2067_v13  ;;  %v2247_v2 = vor.u32 %v2589_v63, %v2244_v1  ;;  %v1828_v4 = vld [vmem:[#allocation4 + $0x30] sm:$0xf0]  ;;  %v2553_v9 = vld [vmem:[#allocation4 + $0x244] sm:$0xf]  ;;  %v2608_v61 = vld [vmem:[#allocation4 + $0x3f4] sm:$0xf0] }
  0x50   :  { %1165 = vmatpush.bf16.msrb.mxu3 %v2195_v14  ;;  %v2100_v10 = vld [vmem:[#allocation4 + $0x250] sm:$0xf0]  ;;  %v2585_v11 = vld [vmem:[#allocation4 + $0x344] sm:$0xf]  ;;  %v1898_v62 = vld [vmem:[#allocation4 + $0xa8] sm:$0xf] }
  0x51   :  { %1172 = vmatpush.bf16.msra.mxu0 %v1927_v3  ;;  %v2485_v3 = vld [vmem:[#allocation4 + $0x24] sm:$0xf]  ;;  %v2103_v12 = vor.u32 %v2553_v9, %v2100_v10  ;;  %v2228_v13 = vld [vmem:[#allocation4 + $0x350] sm:$0xf0]  ;;  %v2504_v63 = vld [vmem:[#allocation4 + $0xb4] sm:$0xf0]  ;;  %v2315_v9 = vor.u32 %v2608_v61, %v2314_v58 }
  0x52   :  { %1186 = vmatpush.bf16.msra.mxu1 %v2055_v7  ;;  %v1831_v6 = vor.u32 %v2485_v3, %v1828_v4  ;;  %v1956_v7 = vld [vmem:[#allocation4 + $0x130] sm:$0xf0]  ;;  %v2231_v14 = vor.u32 %v2585_v11, %v2228_v13  ;;  %v2581_v23 = vld [vmem:[#allocation4 + $0x324] sm:$0xf]  ;;  %v2026_v3 = vld [vmem:[#allocation4 + $0x1a8] sm:$0xf]  ;;  %v1899_v10 = vor.u32 %v2504_v63, %v1898_v62 }
  0x53   :  { %1200 = vmatpush.bf16.msra.mxu2 %v2183_v15  ;;  %v1959_v8 = vor.u32 %v2517_v5, %v1956_v7  ;;  %v2481_v15 = vld [vmem:[#allocation4 + $0x4] sm:$0xf]  ;;  %v1940_v19 = vld [vmem:[#allocation4 + $0x110] sm:$0xf0]  ;;  %v2536_v4 = vld [vmem:[#allocation4 + $0x1b4] sm:$0xf0] }
  0x54   :  { %1214 = vmatpush.bf16.msra.mxu3 %v2311_v17  ;;  %v2513_v17 = vld [vmem:[#allocation4 + $0x104] sm:$0xf]  ;;  %v2084_v22 = vld [vmem:[#allocation4 + $0x230] sm:$0xf0]  ;;  %v2170_v11 = vld [vmem:[#allocation4 + $0x2c8] sm:$0xf] }
  0x55   :  { %1173 = vmatpush.bf16.msra.mxu0 %v1911_v16  ;;  %v1812_v16 = vld [vmem:[#allocation4 + $0x10] sm:$0xf0]  ;;  %v1943_v20 = vor.u32 %v2513_v17, %v1940_v19  ;;  %v2577_v30 = vld [vmem:[#allocation4 + $0x304] sm:$0xf]  ;;  %v2298_v13 = vld [vmem:[#allocation4 + $0x3c8] sm:$0xf] }
  0x56   :  { %1187 = vmatpush.bf16.msra.mxu1 %v2039_v21  ;;  %v1815_v18 = vor.u32 %v2481_v15, %v1812_v16  ;;  %v2549_v21 = vld [vmem:[#allocation4 + $0x224] sm:$0xf]  ;;  %v2212_v24 = vld [vmem:[#allocation4 + $0x330] sm:$0xf0]  ;;  %v2027_v15 = vor.u32 %v2536_v4, %v2026_v3  ;;  %v2604_v16 = vld [vmem:[#allocation4 + $0x3d4] sm:$0xf0] }
  0x57   :  { %1201 = vmatpush.bf16.msra.mxu2 %v2167_v27  ;;  %v2087_v25 = vor.u32 %v2549_v21, %v2084_v22  ;;  %v2215_v26 = vor.u32 %v2581_v23, %v2212_v24  ;;  %v2545_v27 = vld [vmem:[#allocation4 + $0x204] sm:$0xf]  ;;  %v2196_v31 = vld [vmem:[#allocation4 + $0x310] sm:$0xf0]  ;;  %v1882_v17 = vld [vmem:[#allocation4 + $0x88] sm:$0xf]  ;;  %v2299_v22 = vor.u32 %v2604_v16, %v2298_v13 }
  0x58   :  { %1215 = vmatpush.bf16.msra.mxu3 %v2295_v29  ;;  %v2199_v32 = vor.u32 %v2577_v30, %v2196_v31  ;;  %v2010_v19 = vld [vmem:[#allocation4 + $0x188] sm:$0xf]  ;;  %v2496_v30 = vld [vmem:[#allocation4 + $0x74] sm:$0xf0] }
  0x59   :  { %1174 = vmatpush.bf16.msra.mxu0 %v1895_v28  ;;  %v2068_v28 = vld [vmem:[#allocation4 + $0x210] sm:$0xf0]  ;;  %v2154_v24 = vld [vmem:[#allocation4 + $0x2a8] sm:$0xf]  ;;  %v2520_v58 = vld [vmem:[#allocation4 + $0x134] sm:$0xf0] }
  0x5a   :  { %1188 = vmatpush.bf16.msra.mxu1 %v2023_v33  ;;  %v2071_v29 = vor.u32 %v2545_v27, %v2068_v28  ;;  %v2282_v27 = vld [vmem:[#allocation4 + $0x3a8] sm:$0xf]  ;;  %v2600_v28 = vld [vmem:[#allocation4 + $0x3b4] sm:$0xf0] }
  0x5b   :  { %1202 = vmatpush.bf16.msra.mxu2 %v2151_v39  ;;  %v1994_v31 = vld [vmem:[#allocation4 + $0x168] sm:$0xf]  ;;  %v2556_v62 = vld [vmem:[#allocation4 + $0x254] sm:$0xf0] }
  0x5c   :  { %1216 = vmatpush.bf16.msra.mxu3 %v2279_v41  ;;  %v2106_v61 = vld [vmem:[#allocation4 + $0x248] sm:$0xf]  ;;  %v2484_v4 = vld [vmem:[#allocation4 + $0x14] sm:$0xf0] }
  0x5d   :  { %1175 = vmatpush.bf16.msra.mxu0 %v1879_v40  ;;  %v2234_v63 = vld [vmem:[#allocation4 + $0x348] sm:$0xf]  ;;  %v2552_v16 = vld [vmem:[#allocation4 + $0x234] sm:$0xf0] }
  0x5e   :  { %1189 = vmatpush.bf16.msra.mxu1 %v2007_v42  ;;  %v2058_v42 = vld [vmem:[#allocation4 + $0x1e8] sm:$0xf] }
  0x5f   :  { %1203 = vmatpush.bf16.msra.mxu2 %v2135_v52  ;;  %v2059_v49 = vor.u32 %v2544_v43, %v2058_v42  ;;  %v2492_v42 = vld [vmem:[#allocation4 + $0x54] sm:$0xf0]  ;;  %v1978_v43 = vld [vmem:[#allocation4 + $0x148] sm:$0xf] }
  0x60   :  { %1217 = vmatpush.bf16.msra.mxu3 %v2263_v56  ;;  %v2186_v56 = vld [vmem:[#allocation4 + $0x2e8] sm:$0xf] }
  0x61   :  { %1176 = vmatpush.bf16.msra.mxu0 %v1863_v46  ;;  %v1818_v3 = vld [vmem:[#allocation4 + $0x8] sm:$0xf] }
  0x62   :  { %1190 = vmatpush.bf16.msra.mxu1 %v1991_v48 }
  0x63   :  { %1204 = vmatpush.bf16.msra.mxu2 %v2119_v0 }
  0x64   :  { %1218 = vmatpush.bf16.msra.mxu3 %v2247_v2 }
  0x65   :  { %1177 = vmatpush.bf16.msra.mxu0 %v1847_v57  ;;  %v2576_v57 = vld [vmem:[#allocation4 + $0x2f4] sm:$0xf0] }
  0x66   :  { %1191 = vmatpush.bf16.msra.mxu1 %v1975_v60  ;;  %v2043_v60 = vor.u32 %v2540_v54, %v2042_v53  ;;  %v2187_v7 = vor.u32 %v2576_v57, %v2186_v56  ;;  %v2250_v53 = vld [vmem:[#allocation4 + $0x368] sm:$0xf]  ;;  %v2592_v54 = vld [vmem:[#allocation4 + $0x374] sm:$0xf0] }
  0x67   :  { %1205 = vmatpush.bf16.msra.mxu2 %v2103_v12  ;;  %v2572_v12 = vld [vmem:[#allocation4 + $0x2d4] sm:$0xf0]  ;;  %v1962_v57 = vld [vmem:[#allocation4 + $0x128] sm:$0xf] }
  0x68   :  { %1219 = vmatpush.bf16.msra.mxu3 %v2231_v14  ;;  %v2171_v21 = vor.u32 %v2572_v12, %v2170_v11  ;;  %v2488_v56 = vld [vmem:[#allocation4 + $0x34] sm:$0xf0]  ;;  %v2542_v11 = vld [vmem:[#allocation4 + $0x1ec] sm:$0xf]  ;;  %v2060_v12 = vld [vmem:[#allocation4 + $0x1f8] sm:$0xf0] }
  0x69   :  { %1178 = vmatpush.bf16.msra.mxu0 %v1831_v6 }
  0x6a   :  { %1192 = vmatpush.bf16.msra.mxu1 %v1959_v8 }
  0x6b   :  { %1206 = vmatpush.bf16.msra.mxu2 %v2087_v25  ;;  %v2568_v25 = vld [vmem:[#allocation4 + $0x2b4] sm:$0xf0] }
  0x6c   :  { %1220 = vmatpush.bf16.msra.mxu3 %v2215_v26 }
  0x6d   :  { %1179 = vmatpush.bf16.msra.mxu0 %v1815_v18  ;;  %v2500_v18 = vld [vmem:[#allocation4 + $0x94] sm:$0xf0] }
  0x6e   :  { %1193 = vmatpush.bf16.msra.mxu1 %v1943_v20  ;;  %v2532_v20 = vld [vmem:[#allocation4 + $0x194] sm:$0xf0]  ;;  %v1883_v23 = vor.u32 %v2500_v18, %v1882_v17  ;;  %v1819_v17 = vor.u32 %v2484_v4, %v1818_v3  ;;  %v2494_v3 = vld [vmem:[#allocation4 + $0x6c] sm:$0xf]  ;;  %v1868_v4 = vld [vmem:[#allocation4 + $0x78] sm:$0xf0] }
  0x6f   :  { %1207 = vmatpush.bf16.msra.mxu2 %v2071_v29  ;;  %v2011_v26 = vor.u32 %v2532_v20, %v2010_v19  ;;  %v1866_v29 = vld [vmem:[#allocation4 + $0x68] sm:$0xf]  ;;  %v2584_v20 = vld [vmem:[#allocation4 + $0x334] sm:$0xf0] }
  0x70   :  { %1221 = vmatpush.bf16.msra.mxu3 %v2199_v32  ;;  %v2528_v32 = vld [vmem:[#allocation4 + $0x174] sm:$0xf0]  ;;  %v1867_v37 = vor.u32 %v2496_v30, %v1866_v29  ;;  %v2218_v19 = vld [vmem:[#allocation4 + $0x328] sm:$0xf] }
  0x71   :  { %v1995_v38 = vor.u32 %v2528_v32, %v1994_v31  ;;  %v2074_v29 = vld [vmem:[#allocation4 + $0x208] sm:$0xf]  ;;  %v2548_v30 = vld [vmem:[#allocation4 + $0x214] sm:$0xf0] }
  0x72   :  { %v2202_v31 = vld [vmem:[#allocation4 + $0x308] sm:$0xf]  ;;  %v2580_v32 = vld [vmem:[#allocation4 + $0x314] sm:$0xf0] }
  0xad   :  { %v279_v33 = vpop.f32.mrf.mxu0 }
  0xae   :  { %v293_v34 = vpop.f32.mrf.mxu1  ;;  %v326_v35 = vmax.f32 %v279_v33, 0.0  ;;  %v2155_v33 = vor.u32 %v2568_v25, %v2154_v24  ;;  %v1916_v25 = vld [vmem:[#allocation4 + $0xd8] sm:$0xf0] }
  0xaf   :  { %v327_v39 = vmax.f32 %v293_v34, 0.0  ;;  %v2283_v34 = vor.u32 %v2600_v28, %v2282_v27  ;;  %v2044_v27 = vld [vmem:[#allocation4 + $0x1d8] sm:$0xf0]  ;;  %v2219_v28 = vor.u32 %v2584_v20, %v2218_v19  ;;  %v2522_v19 = vld [vmem:[#allocation4 + $0x14c] sm:$0xf] }
  0xb0   :  { %v1980_v20 = vld [vmem:[#allocation4 + $0x158] sm:$0xf0] }
  0xb5   :  { %v307_v36 = vpop.f32.mrf.mxu2  ;;  %v281_v41 = vpop.f32.mrf.mxu0 }
  0xb6   :  { %v321_v40 = vpop.f32.mrf.mxu3  ;;  %v330_v44 = vmax.f32 %v281_v41, 0.0  ;;  %v295_v45 = vpop.f32.mrf.mxu1  ;;  %v328_v0 = vmax.f32 %v307_v36, 0.0  ;;  %v2564_v36 = vld [vmem:[#allocation4 + $0x294] sm:$0xf0]  ;;  %v1850_v41 = vld [vmem:[#allocation4 + $0x48] sm:$0xf] }
  0xb7   :  { %v331_v46 = vmax.f32 %v295_v45, 0.0  ;;  %v329_v5 = vmax.f32 %v321_v40, 0.0  ;;  %v2596_v40 = vld [vmem:[#allocation4 + $0x394] sm:$0xf0]  ;;  %v1851_v50 = vor.u32 %v2492_v42, %v1850_v41  ;;  %v1900_v41 = vld [vmem:[#allocation4 + $0xb8] sm:$0xf0] }
  0xb8   :  { %v2779_v48 = vpack.c.bf16 %v330_v44, %v326_v35  ;;  %v2138_v35 = vld [vmem:[#allocation4 + $0x288] sm:$0xf]  ;;  %v2524_v44 = vld [vmem:[#allocation4 + $0x154] sm:$0xf0]  ;;  %v2534_v42 = vld [vmem:[#allocation4 + $0x1ac] sm:$0xf] }
  0xb9   :  { %v2781_v52 = vpack.c.bf16 %v331_v46, %v327_v39  ;;  %v2266_v39 = vld [vmem:[#allocation4 + $0x388] sm:$0xf]  ;;  %v2139_v45 = vor.u32 %v2564_v36, %v2138_v35  ;;  %v1979_v51 = vor.u32 %v2524_v44, %v1978_v43  ;;  %v2028_v43 = vld [vmem:[#allocation4 + $0x1b8] sm:$0xf0]  ;;  %v2203_v44 = vor.u32 %v2580_v32, %v2202_v31  ;;  %v2518_v31 = vld [vmem:[#allocation4 + $0x12c] sm:$0xf] }
  0xba   :  { %1124 = vmatmul.bf16.vlgmr.msrb.gmra.mxu0 %v2779_v48  ;;  %v2267_v46 = vor.u32 %v2596_v40, %v2266_v39  ;;  %v2502_v39 = vld [vmem:[#allocation4 + $0xac] sm:$0xf]  ;;  %v2075_v40 = vor.u32 %v2548_v30, %v2074_v29  ;;  %v1836_v30 = vld [vmem:[#allocation4 + $0x38] sm:$0xf0] }
  0xbb   :  { %1138 = vmatmul.bf16.vlgmr.msrb.gmra.mxu1 %v2781_v52  ;;  %1228 = vmatpush.bf16.msrb.mxu0 %v1931_v47  ;;  %v2122_v47 = vld [vmem:[#allocation4 + $0x268] sm:$0xf]  ;;  %v2486_v29 = vld [vmem:[#allocation4 + $0x2c] sm:$0xf]  ;;  %v1964_v32 = vld [vmem:[#allocation4 + $0x138] sm:$0xf0] }
  0xbc   :  { %1242 = vmatpush.bf16.msrb.mxu1 %v2059_v49  ;;  %v2560_v49 = vld [vmem:[#allocation4 + $0x274] sm:$0xf0] }
  0xbd   :  { %v309_v59 = vpop.f32.mrf.mxu2 }
  0xbe   :  { %v332_v1 = vmax.f32 %v309_v59, 0.0  ;;  %v323_v2 = vpop.f32.mrf.mxu3  ;;  %v2123_v59 = vor.u32 %v2560_v49, %v2122_v47  ;;  %v2570_v47 = vld [vmem:[#allocation4 + $0x2cc] sm:$0xf]  ;;  %v2172_v49 = vld [vmem:[#allocation4 + $0x2d8] sm:$0xf0] }
  0xbf   :  { %v333_v6 = vmax.f32 %v323_v2, 0.0  ;;  %1229 = vmatpush.bf16.msrb.mxu0 %v1915_v55  ;;  %v1834_v55 = vld [vmem:[#allocation4 + $0x28] sm:$0xf]  ;;  %v2588_v2 = vld [vmem:[#allocation4 + $0x354] sm:$0xf0] }
  0xc0   :  { %v2785_v8 = vpack.c.bf16 %v332_v1, %v328_v0  ;;  %1243 = vmatpush.bf16.msrb.mxu1 %v2043_v60  ;;  %v2251_v60 = vor.u32 %v2592_v54, %v2250_v53  ;;  %v1835_v0 = vor.u32 %v2488_v56, %v1834_v55  ;;  %v1963_v1 = vor.u32 %v2520_v58, %v1962_v57  ;;  %v2602_v53 = vld [vmem:[#allocation4 + $0x3cc] sm:$0xf]  ;;  %v2300_v54 = vld [vmem:[#allocation4 + $0x3d8] sm:$0xf0] }
  0xc1   :  { %v2787_v14 = vpack.c.bf16 %v333_v6, %v329_v5  ;;  %v1946_v5 = vld [vmem:[#allocation4 + $0x108] sm:$0xf]  ;;  %v2516_v6 = vld [vmem:[#allocation4 + $0x114] sm:$0xf0]  ;;  %v2235_v13 = vor.u32 %v2588_v2, %v2234_v63  ;;  %v2498_v55 = vld [vmem:[#allocation4 + $0x8c] sm:$0xf] }
  0xc2   :  { %1152 = vmatmul.bf16.vlgmr.msrb.gmra.mxu2 %v2785_v8  ;;  %v1947_v18 = vor.u32 %v2516_v6, %v1946_v5  ;;  %v1884_v56 = vld [vmem:[#allocation4 + $0x98] sm:$0xf0]  ;;  %v2530_v57 = vld [vmem:[#allocation4 + $0x18c] sm:$0xf] }
  0xc3   :  { %1166 = vmatmul.bf16.vlgmr.msrb.gmra.mxu3 %v2787_v14  ;;  %1256 = vmatpush.bf16.msrb.mxu2 %v2187_v7  ;;  %v2510_v7 = vld [vmem:[#allocation4 + $0xec] sm:$0xf]  ;;  %v2012_v58 = vld [vmem:[#allocation4 + $0x198] sm:$0xf0]  ;;  %v1887_v63 = vor.u32 %v2498_v55, %v1884_v56 }
  0xc4   :  { %1270 = vmatpush.bf16.msrb.mxu3 %v2315_v9  ;;  %1230 = vmatpush.bf16.msrb.mxu0 %v1899_v10  ;;  %v2107_v9 = vor.u32 %v2556_v62, %v2106_v61  ;;  %v1932_v10 = vld [vmem:[#allocation4 + $0xf8] sm:$0xf0]  ;;  %v2566_v61 = vld [vmem:[#allocation4 + $0x2ac] sm:$0xf] }
  0xc5   :  { %1244 = vmatpush.bf16.msrb.mxu1 %v2027_v15  ;;  %v2090_v15 = vld [vmem:[#allocation4 + $0x228] sm:$0xf]  ;;  %v2156_v62 = vld [vmem:[#allocation4 + $0x2b8] sm:$0xf0]  ;;  %v2526_v5 = vld [vmem:[#allocation4 + $0x16c] sm:$0xf] }
  0xc6   :  { %v2091_v24 = vor.u32 %v2552_v16, %v2090_v15  ;;  %v2284_v2 = vld [vmem:[#allocation4 + $0x3b8] sm:$0xf0]  ;;  %v2594_v15 = vld [vmem:[#allocation4 + $0x38c] sm:$0xf] }
  0xc7   :  { %1257 = vmatpush.bf16.msrb.mxu2 %v2171_v21  ;;  %v1935_v21 = vor.u32 %v2510_v7, %v1932_v10  ;;  %v1996_v6 = vld [vmem:[#allocation4 + $0x178] sm:$0xf0]  ;;  %v2159_v7 = vor.u32 %v2566_v61, %v2156_v62  ;;  %v2562_v10 = vld [vmem:[#allocation4 + $0x28c] sm:$0xf] }
  0xc8   :  { %1271 = vmatpush.bf16.msrb.mxu3 %v2299_v22  ;;  %1231 = vmatpush.bf16.msrb.mxu0 %v1883_v23  ;;  %v2063_v22 = vor.u32 %v2542_v11, %v2060_v12  ;;  %v2506_v23 = vld [vmem:[#allocation4 + $0xcc] sm:$0xf]  ;;  %v2140_v11 = vld [vmem:[#allocation4 + $0x298] sm:$0xf0]  ;;  %v1871_v12 = vor.u32 %v2494_v3, %v1868_v4 }
  0xc9   :  { %1245 = vmatpush.bf16.msrb.mxu1 %v2011_v26  ;;  %v2538_v26 = vld [vmem:[#allocation4 + $0x1cc] sm:$0xf]  ;;  %v1919_v35 = vor.u32 %v2506_v23, %v1916_v25  ;;  %v2268_v16 = vld [vmem:[#allocation4 + $0x398] sm:$0xf0] }
  0xca   :  { %1180 = vmatmul.bf16.vlgmr.msra.gmra.mxu0 %v2779_v48  ;;  %v2047_v36 = vor.u32 %v2538_v26, %v2044_v27  ;;  %v2558_v23 = vld [vmem:[#allocation4 + $0x26c] sm:$0xf]  ;;  %v1983_v26 = vor.u32 %v2522_v19, %v1980_v20  ;;  %v2616_v55 = vld [vmem:[#allocation6 + $0x38] sm:$0xff]  ;;  %v2617_v20 = vld [vmem:[#allocation6 + $0x40] sm:$0xff] }
  0xcb   :  { %1258 = vmatpush.bf16.msrb.mxu2 %v2155_v33  ;;  %1194 = vmatmul.bf16.vlgmr.msra.gmra.mxu1 %v2781_v52  ;;  %v2574_v33 = vld [vmem:[#allocation4 + $0x2ec] sm:$0xf]  ;;  %v2204_v61 = vld [vmem:[#allocation4 + $0x318] sm:$0xf0] }
  0xcc   :  { %1272 = vmatpush.bf16.msrb.mxu3 %v2283_v34  ;;  %1232 = vmatpush.bf16.msrb.mxu0 %v1867_v37  ;;  %v2188_v34 = vld [vmem:[#allocation4 + $0x2f8] sm:$0xf0]  ;;  %v2606_v37 = vld [vmem:[#allocation4 + $0x3ec] sm:$0xf] }
  0xcd   :  { %1246 = vmatpush.bf16.msrb.mxu1 %v1995_v38  ;;  %v2316_v38 = vld [vmem:[#allocation4 + $0x3f8] sm:$0xf0]  ;;  %v2590_v27 = vld [vmem:[#allocation4 + $0x36c] sm:$0xf] }
  0xce   :  { %v2612_v3 = vld [vmem:[#allocation6 + $0x18] sm:$0xff] }
  0xcf   :  { %1259 = vmatpush.bf16.msrb.mxu2 %v2139_v45  ;;  %v2191_v45 = vor.u32 %v2574_v33, %v2188_v34  ;;  %v2624_v4 = vld [vmem:[#allocation6 + $0x78] sm:$0xff] }
  0xd0   :  { %1273 = vmatpush.bf16.msrb.mxu3 %v2267_v46  ;;  %1233 = vmatpush.bf16.msrb.mxu0 %v1851_v50  ;;  %v2319_v46 = vor.u32 %v2606_v37, %v2316_v38  ;;  %v1903_v50 = vor.u32 %v2502_v39, %v1900_v41  ;;  %v1839_v37 = vor.u32 %v2486_v29, %v1836_v30  ;;  %v2586_v39 = vld [vmem:[#allocation4 + $0x34c] sm:$0xf] }
  0xd1   :  { %1247 = vmatpush.bf16.msrb.mxu1 %v1979_v51  ;;  %v2031_v51 = vor.u32 %v2534_v42, %v2028_v43  ;;  %v1967_v38 = vor.u32 %v2518_v31, %v1964_v32  ;;  %v2482_v41 = vld [vmem:[#allocation4 + $0xc] sm:$0xf]  ;;  %v1820_v42 = vld [vmem:[#allocation4 + $0x18] sm:$0xf0]  ;;  %v2627_v31 = vld [vmem:[#allocation6 + $0x90] sm:$0xff] }
  0xd2   :  { %1208 = vmatmul.bf16.vlgmr.msra.gmra.mxu2 %v2785_v8  ;;  %v2514_v43 = vld [vmem:[#allocation4 + $0x10c] sm:$0xf] }
  0xd3   :  { %1222 = vmatmul.bf16.vlgmr.msra.gmra.mxu3 %v2787_v14  ;;  %1260 = vmatpush.bf16.msrb.mxu2 %v2123_v59  ;;  %v2175_v59 = vor.u32 %v2570_v47, %v2172_v49  ;;  %v2550_v47 = vld [vmem:[#allocation4 + $0x22c] sm:$0xf]  ;;  %v2092_v49 = vld [vmem:[#allocation4 + $0x238] sm:$0xf0] }
  0xd4   :  { %1274 = vmatpush.bf16.msrb.mxu3 %v2251_v60  ;;  %1234 = vmatpush.bf16.msrb.mxu0 %v1835_v0  ;;  %v2303_v60 = vor.u32 %v2602_v53, %v2300_v54  ;;  %v2015_v0 = vor.u32 %v2530_v57, %v2012_v58  ;;  %v2582_v53 = vld [vmem:[#allocation4 + $0x32c] sm:$0xf]  ;;  %v2220_v54 = vld [vmem:[#allocation4 + $0x338] sm:$0xf0]  ;;  %v2095_v56 = vor.u32 %v2550_v47, %v2092_v49 }
  0xd5   :  { %1248 = vmatpush.bf16.msrb.mxu1 %v1963_v1  ;;  %v2598_v1 = vld [vmem:[#allocation4 + $0x3ac] sm:$0xf]  ;;  %v2223_v57 = vor.u32 %v2582_v53, %v2220_v54 }
  0xd6   :  { %v2546_v58 = vld [vmem:[#allocation4 + $0x20c] sm:$0xf] }
  0xd7   :  { %1261 = vmatpush.bf16.msrb.mxu2 %v2107_v9  ;;  %v2287_v9 = vor.u32 %v2598_v1, %v2284_v2  ;;  %v2614_v1 = vld [vmem:[#allocation6 + $0x28] sm:$0xff]  ;;  %v2613_v2 = vld [vmem:[#allocation6 + $0x20] sm:$0xff] }
  0xd8   :  { %1275 = vmatpush.bf16.msrb.mxu3 %v2235_v13  ;;  %1235 = vmatpush.bf16.msrb.mxu0 %v1819_v17  ;;  %v1999_v13 = vor.u32 %v2526_v5, %v1996_v6  ;;  %v2490_v17 = vld [vmem:[#allocation4 + $0x4c] sm:$0xf]  ;;  %v2623_v5 = vld [vmem:[#allocation6 + $0x70] sm:$0xff] }
  0xd9   :  { %1249 = vmatpush.bf16.msrb.mxu1 %v1947_v18  ;;  %v1852_v18 = vld [vmem:[#allocation4 + $0x58] sm:$0xf0]  ;;  %v2622_v6 = vld [vmem:[#allocation6 + $0x68] sm:$0xff] }
  0xda   :  { %v1855_v25 = vor.u32 %v2490_v17, %v1852_v18  ;;  %v2630_v17 = vld [vmem:[#allocation6 + $0xa8] sm:$0xff] }
  0xdb   :  { %1262 = vmatpush.bf16.msrb.mxu2 %v2091_v24  ;;  %1236 = vmatmul.bf16.vlgmr.msrb.gmra.mxu0 %v2779_v48  ;;  %v2124_v24 = vld [vmem:[#allocation4 + $0x278] sm:$0xf0] }
  0xdc   :  { %1284 = vmatpush.bf16.msra.mxu0 %v1935_v21  ;;  %1276 = vmatpush.bf16.msrb.mxu3 %v2219_v28  ;;  %v2143_v21 = vor.u32 %v2562_v10, %v2140_v11  ;;  %v2252_v28 = vld [vmem:[#allocation4 + $0x378] sm:$0xf0]  ;;  %v2127_v33 = vor.u32 %v2558_v23, %v2124_v24 }
  0xdd   :  { %1298 = vmatpush.bf16.msra.mxu1 %v2063_v22  ;;  %v2271_v22 = vor.u32 %v2594_v15, %v2268_v16  ;;  %v2255_v34 = vor.u32 %v2590_v27, %v2252_v28  ;;  %v2806_v15 = vld [vmem:[%s2824_s3] sm:$0xf]  ;;  %v2618_v16 = vld [vmem:[#allocation6 + $0x48] sm:$0xff] }
  0xde   :  { %1250 = vmatmul.bf16.vlgmr.msrb.gmra.mxu1 %v2781_v52  ;;  %v468_v18 = vperm.slane %v2806_v15, 0 }
  0xdf   :  { %1263 = vmatpush.bf16.msrb.mxu2 %v2075_v40  ;;  %v2236_v40 = vld [vmem:[#allocation4 + $0x358] sm:$0xf0] }
  0xe0   :  { %1285 = vmatpush.bf16.msra.mxu0 %v1919_v35  ;;  %1277 = vmatpush.bf16.msrb.mxu3 %v2203_v44  ;;  %v2554_v35 = vld [vmem:[#allocation4 + $0x24c] sm:$0xf]  ;;  %v1948_v44 = vld [vmem:[#allocation4 + $0x118] sm:$0xf0] }
  0xe1   :  { %1299 = vmatpush.bf16.msra.mxu1 %v2047_v36  ;;  %v2108_v36 = vld [vmem:[#allocation4 + $0x258] sm:$0xf0] }
  0xe2   :  { %1264 = vmatmul.bf16.vlgmr.msrb.gmra.mxu2 %v2785_v8 }
  0xe3   :  { %1312 = vmatpush.bf16.msra.mxu2 %v2191_v45  ;;  %1278 = vmatmul.bf16.vlgmr.msrb.gmra.mxu3 %v2787_v14  ;;  %v2111_v45 = vor.u32 %v2554_v35, %v2108_v36 }
  0xe4   :  { %1326 = vmatpush.bf16.msra.mxu3 %v2319_v46  ;;  %1286 = vmatpush.bf16.msra.mxu0 %v1903_v50  ;;  %v2239_v46 = vor.u32 %v2586_v39, %v2236_v40  ;;  %v1823_v50 = vor.u32 %v2482_v41, %v1820_v42  ;;  %v469_v39 = vperm.slane %v2806_v15, 1 }
  0xe5   :  { %1300 = vmatpush.bf16.msra.mxu1 %v2031_v51  ;;  %v1951_v51 = vor.u32 %v2514_v43, %v1948_v44  ;;  %v2625_v44 = vld [vmem:[#allocation6 + $0x80] sm:$0xff] }
  0xe7   :  { %1313 = vmatpush.bf16.msra.mxu2 %v2175_v59  ;;  %v2076_v59 = vld [vmem:[#allocation4 + $0x218] sm:$0xf0] }
  0xe8   :  { %1327 = vmatpush.bf16.msra.mxu3 %v2303_v60  ;;  %1287 = vmatpush.bf16.msra.mxu0 %v1887_v63  ;;  %v2578_v60 = vld [vmem:[#allocation4 + $0x30c] sm:$0xf]  ;;  %v2079_v62 = vor.u32 %v2546_v58, %v2076_v59 }
  0xe9   :  { %1301 = vmatpush.bf16.msra.mxu1 %v2015_v0  ;;  %v2207_v63 = vor.u32 %v2578_v60, %v2204_v61  ;;  %v2615_v0 = vld [vmem:[#allocation6 + $0x30] sm:$0xff] }
  0xeb   :  { %1314 = vmatpush.bf16.msra.mxu2 %v2159_v7  ;;  %v2620_v7 = vld [vmem:[#allocation6 + $0x58] sm:$0xff] }
  0xec   :  { %1328 = vmatpush.bf16.msra.mxu3 %v2287_v9  ;;  %1288 = vmatpush.bf16.msra.mxu0 %v1871_v12  ;;  %v2632_v9 = vld [vmem:[#allocation6 + $0xb8] sm:$0xff]  ;;  %v2619_v12 = vld [vmem:[#allocation6 + $0x50] sm:$0xff] }
  0xed   :  { %1302 = vmatpush.bf16.msra.mxu1 %v1999_v13  ;;  %v2631_v13 = vld [vmem:[#allocation6 + $0xb0] sm:$0xff] }
  0xef   :  { %1315 = vmatpush.bf16.msra.mxu2 %v2143_v21  ;;  %v2629_v21 = vld [vmem:[#allocation6 + $0xa0] sm:$0xff] }
  0xf0   :  { %1329 = vmatpush.bf16.msra.mxu3 %v2271_v22  ;;  %1289 = vmatpush.bf16.msra.mxu0 %v1855_v25 }
  0xf1   :  { %1303 = vmatpush.bf16.msra.mxu1 %v1983_v26  ;;  %v2628_v26 = vld [vmem:[#allocation6 + $0x98] sm:$0xff] }
  0xf3   :  { %1316 = vmatpush.bf16.msra.mxu2 %v2127_v33 }
  0xf4   :  { %1330 = vmatpush.bf16.msra.mxu3 %v2255_v34  ;;  %1290 = vmatpush.bf16.msra.mxu0 %v1839_v37 }
  0xf5   :  { %1304 = vmatpush.bf16.msra.mxu1 %v1967_v38  ;;  %v2626_v38 = vld [vmem:[#allocation6 + $0x88] sm:$0xff] }
  0xf7   :  { %1317 = vmatpush.bf16.msra.mxu2 %v2111_v45  ;;  %v2640_v45 = vld [vmem:[#allocation6 + $0xf8] sm:$0xff] }
  0xf8   :  { %1331 = vmatpush.bf16.msra.mxu3 %v2239_v46  ;;  %1291 = vmatpush.bf16.msra.mxu0 %v1823_v50 }
  0xf9   :  { %1305 = vmatpush.bf16.msra.mxu1 %v1951_v51  ;;  %v2639_v51 = vld [vmem:[#allocation6 + $0xf0] sm:$0xff] }
  0xfb   :  { %1318 = vmatpush.bf16.msra.mxu2 %v2095_v56  ;;  %1292 = vmatmul.bf16.vlgmr.msra.gmra.mxu0 %v2779_v48  ;;  %v2611_v48 = vld [vmem:[#allocation6 + $0x10] sm:$0xff]  ;;  %v2638_v56 = vld [vmem:[#allocation6 + $0xe8] sm:$0xff] }
  0xfc   :  { %1612 = vmatpush.bf16.msrb.mxu0 %v2616_v55  ;;  %1332 = vmatpush.bf16.msra.mxu3 %v2223_v57 }
  0xfd   :  { %1306 = vmatmul.bf16.vlgmr.msra.gmra.mxu1 %v2781_v52  ;;  %v2610_v52 = vld [vmem:[#allocation6 + $0x8] sm:$0xff] }
  0xfe   :  { %1626 = vmatpush.bf16.msrb.mxu1 %v2624_v4 }
  0xff   :  { %1319 = vmatpush.bf16.msra.mxu2 %v2079_v62 }
 0x100   :  { %1333 = vmatpush.bf16.msra.mxu3 %v2207_v63  ;;  %1613 = vmatpush.bf16.msrb.mxu0 %v2615_v0  ;;  %v2637_v0 = vld [vmem:[#allocation6 + $0xe0] sm:$0xff] }
 0x102   :  { %1320 = vmatmul.bf16.vlgmr.msra.gmra.mxu2 %v2785_v8  ;;  %1627 = vmatpush.bf16.msrb.mxu1 %v2623_v5  ;;  %v2609_v8 = vld [vmem:[#allocation6] sm:$0xff]  ;;  %v2636_v5 = vld [vmem:[#allocation6 + $0xd8] sm:$0xff] }
 0x103   :  { %1334 = vmatmul.bf16.vlgmr.msra.gmra.mxu3 %v2787_v14  ;;  %v2621_v14 = vld [vmem:[#allocation6 + $0x60] sm:$0xff]  ;;  %1640 = vmatpush.bf16.msrb.mxu2 %v2632_v9  ;;  %v2635_v9 = vld [vmem:[#allocation6 + $0xd0] sm:$0xff] }
 0x104   :  { %1614 = vmatpush.bf16.msrb.mxu0 %v2614_v1  ;;  %1654 = vmatpush.bf16.msrb.mxu3 %v2640_v45 }
 0x106   :  { %1628 = vmatpush.bf16.msrb.mxu1 %v2622_v6 }
 0x107   :  { %1641 = vmatpush.bf16.msrb.mxu2 %v2631_v13  ;;  %v2634_v13 = vld [vmem:[#allocation6 + $0xc8] sm:$0xff] }
 0x108   :  { %1615 = vmatpush.bf16.msrb.mxu0 %v2613_v2  ;;  %1655 = vmatpush.bf16.msrb.mxu3 %v2639_v51  ;;  %v470_v2 = vperm.slane %v2806_v15, 2 }
 0x10a   :  { %1629 = vmatpush.bf16.msrb.mxu1 %v2621_v14 }
 0x10b   :  { %1642 = vmatpush.bf16.msrb.mxu2 %v2630_v17 }
 0x10c   :  { %1616 = vmatpush.bf16.msrb.mxu0 %v2612_v3  ;;  %1656 = vmatpush.bf16.msrb.mxu3 %v2638_v56 }
 0x10e   :  { %1630 = vmatpush.bf16.msrb.mxu1 %v2620_v7 }
 0x10f   :  { %1643 = vmatpush.bf16.msrb.mxu2 %v2629_v21  ;;  %v2633_v21 = vld [vmem:[#allocation6 + $0xc0] sm:$0xff] }
 0x110   :  { %1617 = vmatpush.bf16.msrb.mxu0 %v2611_v48  ;;  %1657 = vmatpush.bf16.msrb.mxu3 %v2637_v0 }
 0x112   :  { %1631 = vmatpush.bf16.msrb.mxu1 %v2619_v12 }
 0x113   :  { %1644 = vmatpush.bf16.msrb.mxu2 %v2628_v26 }
 0x114   :  { %1618 = vmatpush.bf16.msrb.mxu0 %v2610_v52  ;;  %1658 = vmatpush.bf16.msrb.mxu3 %v2636_v5 }
 0x116   :  { %1632 = vmatpush.bf16.msrb.mxu1 %v2618_v16 }
 0x117   :  { %1645 = vmatpush.bf16.msrb.mxu2 %v2627_v31 }
 0x118   :  { %1619 = vmatpush.bf16.msrb.mxu0 %v2609_v8  ;;  %1659 = vmatpush.bf16.msrb.mxu3 %v2635_v9 }
 0x11a   :  { %1633 = vmatpush.bf16.msrb.mxu1 %v2617_v20 }
 0x11b   :  { %1646 = vmatpush.bf16.msrb.mxu2 %v2626_v38 }
 0x11c   :  { %1660 = vmatpush.bf16.msrb.mxu3 %v2634_v13 }
 0x11f   :  { %1647 = vmatpush.bf16.msrb.mxu2 %v2625_v44 }
 0x120   :  { %1661 = vmatpush.bf16.msrb.mxu3 %v2633_v21 }
 0x137   :  { %v1125_v10 = vpop.f32.mrf.mxu0 }
 0x138   :  { %v1139_v11 = vpop.f32.mrf.mxu1  ;;  %v1126_v22 = vadd.f32 %v1125_v10, %v468_v18 }
 0x13a   :  { %v1140_v27 = vadd.f32 %v1139_v11, %v1126_v22 }
 0x13f   :  { %v1127_v19 = vpop.f32.mrf.mxu0 }
 0x140   :  { %v1141_v23 = vpop.f32.mrf.mxu1  ;;  %v1128_v28 = vadd.f32 %v1127_v19, %v468_v18 }
 0x142   :  { %v1142_v32 = vadd.f32 %v1141_v23, %v1128_v28  ;;  %v471_v28 = vperm.slane %v2806_v15, 3 }
 0x145   :  { %v1153_v24 = vpop.f32.mrf.mxu2 }
 0x146   :  { %v1167_v25 = vpop.f32.mrf.mxu3  ;;  %v1154_v30 = vadd.f32 %v1153_v24, %v1140_v27 }
 0x147   :  { %v1181_v29 = vpop.f32.mrf.mxu0 }
 0x148   :  { %v1168_v34 = vadd.f32 %v1167_v25, %v1154_v30  ;;  %v1195_v35 = vpop.f32.mrf.mxu1  ;;  %v1182_v46 = vadd.f32 %v1181_v29, %v469_v39 }
 0x14a   :  { %v1340_v42 = vmax.f32 %v1168_v34, 0.0  ;;  %v1196_v53 = vadd.f32 %v1195_v35, %v1182_v46 }
 0x14d   :  { %v1155_v33 = vpop.f32.mrf.mxu2 }
 0x14e   :  { %v1156_v36 = vadd.f32 %v1155_v33, %v1142_v32  ;;  %v1169_v37 = vpop.f32.mrf.mxu3 }
 0x14f   :  { %v1183_v41 = vpop.f32.mrf.mxu0 }
 0x150   :  { %v1170_v40 = vadd.f32 %v1169_v37, %v1156_v36  ;;  %v1184_v54 = vadd.f32 %v1183_v41, %v469_v39  ;;  %v1197_v55 = vpop.f32.mrf.mxu1 }
 0x152   :  { %v1344_v43 = vmax.f32 %v1170_v40, 0.0  ;;  %v1198_v59 = vadd.f32 %v1197_v55, %v1184_v54 }
 0x154   :  { %v1348_v47 = vpack.c.bf16 %v1344_v43, %v1340_v42 }
 0x155   :  { %v1209_v49 = vpop.f32.mrf.mxu2 }
 0x156   :  { %v1223_v50 = vpop.f32.mrf.mxu3  ;;  %1620 = vmatmul.bf16.vlgmr.msrb.gmra.mxu0 %v1348_v47  ;;  %v1210_v57 = vadd.f32 %v1209_v49, %v1196_v53  ;;  %v2648_v47 = vld [vmem:[%s2826_s5] ss:$0 sm:$0xff] }
 0x158   :  { %v1237_v58 = vpop.f32.mrf.mxu0  ;;  %v1224_v61 = vadd.f32 %v1223_v50, %v1210_v57 }
 0x159   :  { %v1238_v6 = vadd.f32 %v1237_v58, %v470_v2 }
 0x15a   :  { %v1341_v3 = vmax.f32 %v1224_v61, 0.0 }
 0x15b   :  { %v1251_v4 = vpop.f32.mrf.mxu1 }
 0x15c   :  { %v1252_v10 = vadd.f32 %v1251_v4, %v1238_v6 }
 0x15d   :  { %v1211_v60 = vpop.f32.mrf.mxu2 }
 0x15e   :  { %v1212_v62 = vadd.f32 %v1211_v60, %v1198_v59  ;;  %v1225_v63 = vpop.f32.mrf.mxu3 }
 0x160   :  { %v1226_v1 = vadd.f32 %v1225_v63, %v1212_v62  ;;  %v1239_v8 = vpop.f32.mrf.mxu0 }
 0x161   :  { %v1240_v11 = vadd.f32 %v1239_v8, %v470_v2 }
 0x162   :  { %v1345_v48 = vmax.f32 %v1226_v1, 0.0 }
 0x163   :  { %v1253_v16 = vpop.f32.mrf.mxu1 }
 0x164   :  { %v1349_v52 = vpack.c.bf16 %v1345_v48, %v1341_v3  ;;  %v1254_v17 = vadd.f32 %v1253_v16, %v1240_v11 }
 0x165   :  { %v1265_v14 = vpop.f32.mrf.mxu2 }
 0x166   :  { %v1279_v7 = vpop.f32.mrf.mxu3  ;;  %1634 = vmatmul.bf16.vlgmr.msrb.gmra.mxu1 %v1349_v52  ;;  %v1266_v12 = vadd.f32 %v1265_v14, %v1252_v10 }
 0x168   :  { %v1280_v19 = vadd.f32 %v1279_v7, %v1266_v12 }
 0x16a   :  { %v1342_v24 = vmax.f32 %v1280_v19, 0.0 }
 0x16d   :  { %v1267_v18 = vpop.f32.mrf.mxu2 }
 0x16e   :  { %v1268_v20 = vadd.f32 %v1267_v18, %v1254_v17  ;;  %v1281_v22 = vpop.f32.mrf.mxu3 }
 0x170   :  { %v1282_v23 = vadd.f32 %v1281_v22, %v1268_v20 }
 0x172   :  { %v1346_v25 = vmax.f32 %v1282_v23, 0.0 }
 0x174   :  { %v1350_v26 = vpack.c.bf16 %v1346_v25, %v1342_v24 }
 0x176   :  { %1648 = vmatmul.bf16.vlgmr.msrb.gmra.mxu2 %v1350_v26 }
 0x178   :  { %v1293_v27 = vpop.f32.mrf.mxu0 }
 0x179   :  { %v1294_v30 = vadd.f32 %v1293_v27, %v471_v28 }
 0x17a   :  { %v1307_v29 = vpop.f32.mrf.mxu1 }
 0x17b   :  { %v1308_v34 = vadd.f32 %v1307_v29, %v1294_v30 }
 0x180   :  { %v1295_v31 = vpop.f32.mrf.mxu0 }
 0x181   :  { %v1296_v35 = vadd.f32 %v1295_v31, %v471_v28 }
 0x182   :  { %v1309_v37 = vpop.f32.mrf.mxu1 }
 0x183   :  { %v1310_v38 = vadd.f32 %v1309_v37, %v1296_v35 }
 0x185   :  { %v1321_v32 = vpop.f32.mrf.mxu2 }
 0x186   :  { %v1335_v33 = vpop.f32.mrf.mxu3  ;;  %v1322_v36 = vadd.f32 %v1321_v32, %v1308_v34 }
 0x188   :  { %v1336_v40 = vadd.f32 %v1335_v33, %v1322_v36 }
 0x18a   :  { %v1343_v44 = vmax.f32 %v1336_v40, 0.0 }
 0x18d   :  { %v1323_v39 = vpop.f32.mrf.mxu2 }
 0x18e   :  { %v1324_v41 = vadd.f32 %v1323_v39, %v1310_v38  ;;  %v1337_v42 = vpop.f32.mrf.mxu3 }
 0x190   :  { %v1338_v43 = vadd.f32 %v1337_v42, %v1324_v41 }
 0x192   :  { %v1347_v45 = vmax.f32 %v1338_v43, 0.0 }
 0x194   :  { %v1351_v46 = vpack.c.bf16 %v1347_v45, %v1343_v44 }
 0x196   :  { %1662 = vmatmul.bf16.vlgmr.msrb.gmra.mxu3 %v1351_v46 }
 0x1d3   :  { %v1621_v15 = vpop.f32.mrf.mxu0 }
 0x1d4   :  { %v1622_v51 = vadd.f32 %v2648_v47, %v1621_v15 }
 0x1db   :  { %v1623_v55 = vpop.f32.mrf.mxu0 }
 0x1dc   :  { %v1624_v59 = vadd.f32 %v2648_v47, %v1623_v55 }
 0x1e3   :  { %v1635_v49 = vpop.f32.mrf.mxu1 }
 0x1e4   :  { %v1636_v53 = vadd.f32 %v1635_v49, %v1622_v51 }
 0x1eb   :  { %v1637_v58 = vpop.f32.mrf.mxu1 }
 0x1ec   :  { %v1638_v61 = vadd.f32 %v1637_v58, %v1624_v59 }
 0x1f9   :  { %v1649_v50 = vpop.f32.mrf.mxu2 }
 0x1fa   :  { %v1650_v54 = vadd.f32 %v1649_v50, %v1636_v53 }
 0x201   :  { %v1651_v60 = vpop.f32.mrf.mxu2 }
 0x202   :  { %v1652_v62 = vadd.f32 %v1651_v60, %v1638_v61 }
 0x219   :  { %v1663_v56 = vpop.f32.mrf.mxu3 }
 0x21a   :  { %v1664_v57 = vadd.f32 %v1663_v56, %v1650_v54 }
 0x21c   :  { %1668 = vst [vmem:[%s2827_s6] sm:$0xff] %v1664_v57 }
 0x221   :  { %v1665_v63 = vpop.f32.mrf.mxu3 }
 0x222   :  { %v1666_v0 = vadd.f32 %v1665_v63, %v1652_v62 }
 0x224   :  { %1669 = vst [vmem:[%s2827_s6 + $0x8] sm:$0xff] %v1666_v0 }
 0x225   :  { %1674 = vsyncpa [#allocation3], 1 }
 0x226   :  { %1675 = vsyncpa [#allocation5], 1 }

</bundles_post_ra>
